<compile_context>
chip_gen: v5e
topology: v5e:2x2
jax: 0.10.0
libtpu: 0.0.40
codegen_flags: <defaults>
</compile_context>

<pallas_src>
import functools

import jax
import jax.numpy as jnp
from jax.experimental import pallas as pl
from jax.experimental.pallas import tpu as pltpu  # noqa: F401  (TPU backend)

# ---------------- small synthetic BART config ----------------
VOCAB = 128
D_MODEL = 32
N_HEADS = 2
HEAD_DIM = D_MODEL // N_HEADS
FFN_DIM = 64
N_LAYERS = 2
MAX_POS = 64
PAD_ID = 1
DECODER_START_ID = 2          # BART: decoder_start_token_id == eos (2)
POS_OFFSET = 2                # BART learned positional embedding offset
LN_EPS = 1e-5
NEG_INF = -1e9

# column offsets inside the packed per-layer weight slab `w_in` (row D_MODEL = bias row)
_QKV0, _QKV1 = 0, 3 * D_MODEL                      # self-attn fused QKV      (96 cols)
_SO0,  _SO1  = _QKV1, _QKV1 + D_MODEL              # self-attn out proj       (32)
_CQ0,  _CQ1  = _SO1,  _SO1 + D_MODEL               # cross-attn Q proj        (32)
_CKV0, _CKV1 = _CQ1,  _CQ1 + 2 * D_MODEL           # cross-attn fused KV      (64)
_CO0,  _CO1  = _CKV1, _CKV1 + D_MODEL              # cross-attn out proj      (32)
_F10,  _F11  = _CO1,  _CO1 + FFN_DIM               # fc1                      (64)
W_COLS = _F11                                      # 320

# row layout of the packed LN / small-vector slab `lnp` (each row is (D_MODEL,))
_ROW_LN_EMB_G, _ROW_LN_EMB_B = 0, 1
_LAYER_ROWS = 7   # [ln_self_g, ln_self_b, ln_cross_g, ln_cross_b, ln_fin_g, ln_fin_b, b_fc2]


# ---------------- single fused Pallas kernel ----------------

def _bart_fused_kernel(acts_ref, sbias_ref, cbias_ref, lbl_ref,
                       lm_ref, w_in_ref, w_fc2_ref, lnp_ref,
                       loss_ref, *, B, T, Te):
    scale = 1.0 / (HEAD_DIM ** 0.5)
    BT, BTe = B * T, B * Te

    def ln_row(i):                                   # (1, D) parameter row
        return lnp_ref[i:i + 1, :]

    def layer_norm(v, g, b):
        mu = jnp.mean(v, axis=-1, keepdims=True)
        var = jnp.mean((v - mu) ** 2, axis=-1, keepdims=True)
        return (v - mu) * jax.lax.rsqrt(var + LN_EPS) * g + b

    def attention(q_src, kv_src, bias, w_o, q_off, k_off, v_off):
        # Block-diagonal batched attention: `bias` already carries causal / key-padding
        # / cross-batch masking as additive -1e9; one score matmul per head over all rows.
        out = None
        for h in range(N_HEADS):
            q = q_src[:, q_off + h * HEAD_DIM: q_off + (h + 1) * HEAD_DIM]
            k = kv_src[:, k_off + h * HEAD_DIM: k_off + (h + 1) * HEAD_DIM]
            v = kv_src[:, v_off + h * HEAD_DIM: v_off + (h + 1) * HEAD_DIM]
            s = jax.lax.dot_general(q, k, (((1,), (1,)), ((), ())),
                                    preferred_element_type=jnp.float32) * scale + bias
            m = jnp.max(s, axis=-1, keepdims=True)
            p = jnp.exp(s - m)
            denom = jnp.sum(p, axis=-1, keepdims=True)
            o = jnp.dot(p, v, preferred_element_type=jnp.float32)
            # NOTE: fully-masked rows softmax uniformly over -1e9 (finite); only OK
            # because such rows always carry label == -100.
            o = o * pl.reciprocal(denom, approx=True)
            # fold the head-concat into the output projection: sum_h o_h @ W_o[h-rows]
            proj = jnp.dot(o, w_o[h * HEAD_DIM:(h + 1) * HEAD_DIM, :],
                           preferred_element_type=jnp.float32)
            out = proj if out is None else out + proj
        return out

    # activations blob: rows [0, BT) = decoder token+pos embeddings, [BT, BT+BTe) = encoder states
    x = acts_ref[0:BT, :].astype(jnp.float32)
    enc = acts_ref[BT:BT + BTe, :].astype(jnp.float32)
    self_bias = sbias_ref[...]
    cross_bias = cbias_ref[...]

    # layernorm_embedding
    x = layer_norm(x, ln_row(_ROW_LN_EMB_G), ln_row(_ROW_LN_EMB_B))

    for l in range(N_LAYERS):
        base = 2 + l * _LAYER_ROWS
        slab = w_in_ref[l]                            # (D+1, W_COLS): weights + bias row
        w = slab[0:D_MODEL, :]
        brow = slab[D_MODEL:D_MODEL + 1, :]

        # ---- self attention (fused QKV projection) ----
        qkv = jnp.dot(x, w[:, _QKV0:_QKV1],
                      preferred_element_type=jnp.float32) + brow[:, _QKV0:_QKV1]
        a = attention(qkv, qkv, self_bias, w[:, _SO0:_SO1],
                      q_off=0, k_off=D_MODEL, v_off=2 * D_MODEL)
        a = a + brow[:, _SO0:_SO1]
        x = layer_norm(x + a, ln_row(base + 0), ln_row(base + 1))

        # ---- cross attention (fused KV projection over encoder states) ----
        q_all = jnp.dot(x, w[:, _CQ0:_CQ1],
                        preferred_element_type=jnp.float32) + brow[:, _CQ0:_CQ1]
        kv_all = jnp.dot(enc, w[:, _CKV0:_CKV1],
                         preferred_element_type=jnp.float32) + brow[:, _CKV0:_CKV1]
        a = attention(q_all, kv_all, cross_bias, w[:, _CO0:_CO1],
                      q_off=0, k_off=0, v_off=D_MODEL)
        a = a + brow[:, _CO0:_CO1]
        x = layer_norm(x + a, ln_row(base + 2), ln_row(base + 3))

        # ---- feed-forward ----
        h1 = jnp.dot(x, w[:, _F10:_F11],
                     preferred_element_type=jnp.float32) + brow[:, _F10:_F11]
        # TODO(synk): HF BART uses exact (erf) GELU; tanh approximation used here (EUP-friendly).
        h1 = jax.nn.gelu(h1, approximate=True)
        h2 = jnp.dot(h1, w_fc2_ref[l],
                     preferred_element_type=jnp.float32) + ln_row(base + 6)
        x = layer_norm(x + h2, ln_row(base + 4), ln_row(base + 5))

    # ---- tied LM head (pre-transposed, bias packed as extra row) + cross entropy ----
    lm_w = lm_ref[0:D_MODEL, :]                       # (D, V) -> lane-dense logits
    lm_b = lm_ref[D_MODEL:D_MODEL + 1, :]             # (1, V)
    logits = jnp.dot(x, lm_w, preferred_element_type=jnp.float32) + lm_b   # (BT, V)

    lbl = lbl_ref[...]                                # (BT, 1) int32
    m = jnp.max(logits, axis=-1, keepdims=True)
    lse = jnp.log(jnp.sum(jnp.exp(logits - m), axis=-1, keepdims=True)) + m
    col = jax.lax.broadcasted_iota(jnp.int32, logits.shape, 1)
    picked = jnp.sum(jnp.where(col == lbl, logits, 0.0), axis=-1, keepdims=True)
    valid = (lbl != -100).astype(jnp.float32)         # ignore_index = -100
    tok = (lse - picked) * valid                      # (BT, 1)

    # total & count with a single (1,BT) x (BT,2) matmul
    pair = jnp.concatenate([tok, valid], axis=-1)     # (BT, 2)
    ones_row = jnp.ones((1, BT), jnp.float32)
    sums = jnp.dot(ones_row, pair, preferred_element_type=jnp.float32)     # (1, 2)
    # NOTE: zero valid tokens -> loss 0.0 (PyTorch mean-CE would give NaN).
    loss_ref[...] = sums[:, 0:1] / jnp.maximum(sums[:, 1:2], 1.0)


# ---------------- parameters (pre-packed for the fused kernel) ----------------

def init_params(key):
    keys = jax.random.split(key, 32)
    it = iter(keys)

    def nrm(shape, scale=0.02):
        return jax.random.normal(next(it), shape, jnp.float32) * scale

    L = N_LAYERS
    embed_tokens = nrm((VOCAB, D_MODEL))
    embed_positions = nrm((MAX_POS + POS_OFFSET, D_MODEL))
    final_logits_bias = jnp.zeros((1, VOCAB), jnp.float32)

    # per-layer matmul weights / biases
    w_qkv = nrm((L, D_MODEL, 3 * D_MODEL));  b_qkv = nrm((L, 1, 3 * D_MODEL), 0.01)
    w_so = nrm((L, D_MODEL, D_MODEL));       b_so = nrm((L, 1, D_MODEL), 0.01)
    w_cq = nrm((L, D_MODEL, D_MODEL));       b_cq = nrm((L, 1, D_MODEL), 0.01)
    w_ckv = nrm((L, D_MODEL, 2 * D_MODEL));  b_ckv = nrm((L, 1, 2 * D_MODEL), 0.01)
    w_co = nrm((L, D_MODEL, D_MODEL));       b_co = nrm((L, 1, D_MODEL), 0.01)
    w_f1 = nrm((L, D_MODEL, FFN_DIM));       b_f1 = nrm((L, 1, FFN_DIM), 0.01)
    w_f2 = nrm((L, FFN_DIM, D_MODEL));       b_f2 = nrm((L, 1, D_MODEL), 0.01)

    # packed slab: (L, D+1, W_COLS) — top D rows are the weights, last row the biases
    w_rows = jnp.concatenate([w_qkv, w_so, w_cq, w_ckv, w_co, w_f1], axis=2)   # (L, D, 320)
    b_row = jnp.concatenate([b_qkv, b_so, b_cq, b_ckv, b_co, b_f1], axis=2)    # (L, 1, 320)
    w_in = jnp.concatenate([w_rows, b_row], axis=1)                            # (L, D+1, 320)

    # packed LN / vector params: rows [ln_emb_g, ln_emb_b] + per-layer 7 rows
    ones = jnp.ones((1, D_MODEL), jnp.float32)
    zeros = jnp.zeros((1, D_MODEL), jnp.float32)
    rows = [ones, zeros]                                                       # ln_emb g/b
    for l in range(L):
        rows += [ones, zeros,                # ln_self g/b
                 ones, zeros,                # ln_cross g/b
                 ones, zeros,                # ln_fin g/b
                 b_f2[l]]                    # fc2 bias
    lnp = jnp.concatenate(rows, axis=0)                                        # (2+7L, D)

    # packed tied LM head: (D+1, V) = [embed_tokens^T ; final_logits_bias]
    lm_head = jnp.concatenate([embed_tokens.T, final_logits_bias], axis=0)

    return {
        "embed_tokens": embed_tokens,
        "embed_positions": embed_positions,
        "lm_head": lm_head,
        "w_in": w_in,
        "w_fc2": w_f2,
        "lnp": lnp,
    }


# ---------------- model glue (plain JAX: shift + gathers + mask prep only) ----------------

def bart_loss(params, encoder_outputs, attention_mask, decoder_attention_mask, labels):
    """Mirrors BartForConditionalGeneration(...).loss (dropout disabled / eval mode)."""
    B, T = labels.shape
    Te = encoder_outputs.shape[1]
    labels = labels.astype(jnp.int32)

    # shift_tokens_right(labels, pad, decoder_start)
    dec_ids = jnp.concatenate(
        [jnp.full((B, 1), DECODER_START_ID, jnp.int32), labels[:, :-1]], axis=1)
    dec_ids = jnp.where(dec_ids == -100, PAD_ID, dec_ids)

    # embeddings (gathers kept as JAX glue)
    x = params["embed_tokens"][dec_ids]                                   # (B, T, D)
    pos = params["embed_positions"][jnp.arange(T) + POS_OFFSET]           # (T, D)
    x_flat = (x + pos[None]).reshape(B * T, D_MODEL)
    enc_flat = encoder_outputs.reshape(B * Te, D_MODEL).astype(jnp.float32)
    acts = jnp.concatenate([x_flat, enc_flat], axis=0)                    # (B*(T+Te), D)

    # block-diagonal additive attention biases (cross-batch entries masked out)
    qb = jnp.arange(B * T) // T
    qp = jnp.arange(B * T) % T
    dec_key_ok = decoder_attention_mask.reshape(B * T) > 0
    ok_self = (qb[:, None] == qb[None, :]) & (qp[None, :] <= qp[:, None]) & dec_key_ok[None, :]
    self_bias = jnp.where(ok_self, 0.0, NEG_INF).astype(jnp.float32)      # (B*T, B*T)

    kb = jnp.arange(B * Te) // Te
    enc_key_ok = attention_mask.reshape(B * Te) > 0
    ok_cross = (qb[:, None] == kb[None, :]) & enc_key_ok[None, :]
    cross_bias = jnp.where(ok_cross, 0.0, NEG_INF).astype(jnp.float32)    # (B*T, B*Te)

    labels2d = labels.reshape(B * T, 1)

    kern = functools.partial(_bart_fused_kernel, B=B, T=T, Te=Te)
    loss = pl.pallas_call(
        kern,
        out_shape=jax.ShapeDtypeStruct((1, 1), jnp.float32),
    )(acts, self_bias, cross_bias, labels2d,
      params["lm_head"], params["w_in"], params["w_fc2"], params["lnp"])
    return loss[0, 0]


if __name__ == "__main__":
    key = jax.random.PRNGKey(0)
    kp, ke, kl = jax.random.split(key, 3)
    params = init_params(kp)

    B, T_ENC, T_DEC = 2, 8, 8
    encoder_outputs = jax.random.normal(ke, (B, T_ENC, D_MODEL), jnp.float32)
    attention_mask = jnp.array([[1, 1, 1, 1, 1, 1, 1, 1],
                                [1, 1, 1, 1, 1, 1, 0, 0]], jnp.int32)
    decoder_attention_mask = jnp.array([[1, 1, 1, 1, 1, 1, 1, 1],
                                        [1, 1, 1, 1, 1, 1, 1, 0]], jnp.int32)
    labels = jax.random.randint(kl, (B, T_DEC), 3, VOCAB).astype(jnp.int32)
    labels = labels.at[1, -1].set(-100)   # exercise ignore_index

    loss = jax.jit(bart_loss)(params, encoder_outputs, attention_mask,
                              decoder_attention_mask, labels)
    jax.block_until_ready(loss)
    assert loss.shape == () and bool(jnp.isfinite(loss))
    print("KERNEL_OK")
</pallas_src>

<mosaic_0001>
module attributes {stable_mosaic.version = 11 : i64} {
  func.func @_bart_fused_kernel(%arg0: memref<32x32xf32, #tpu.memory_space<vmem>>, %arg1: memref<16x16xf32, #tpu.memory_space<vmem>>, %arg2: memref<16x16xf32, #tpu.memory_space<vmem>>, %arg3: memref<16x1xi32, #tpu.memory_space<vmem>>, %arg4: memref<33x128xf32, #tpu.memory_space<vmem>>, %arg5: memref<2x33x320xf32, #tpu.memory_space<vmem>>, %arg6: memref<2x64x32xf32, #tpu.memory_space<vmem>>, %arg7: memref<16x32xf32, #tpu.memory_space<vmem>>, %arg8: memref<1x1xf32, #tpu.memory_space<vmem>>) attributes {dimension_semantics = [], scalar_prefetch = 0 : i64, scratch_operands = 0 : i64, tpu.core_type = #tpu.core_type<tc>} {
    %c0 = arith.constant 0 : index
    %c0_0 = arith.constant 0 : index
    %0 = vector.load %arg0[%c0, %c0_0] : memref<32x32xf32, #tpu.memory_space<vmem>>, vector<16x32xf32>
    %c16 = arith.constant 16 : index
    %c0_1 = arith.constant 0 : index
    %1 = vector.load %arg0[%c16, %c0_1] : memref<32x32xf32, #tpu.memory_space<vmem>>, vector<16x32xf32>
    %c0_2 = arith.constant 0 : index
    %c0_3 = arith.constant 0 : index
    %2 = vector.load %arg1[%c0_2, %c0_3] : memref<16x16xf32, #tpu.memory_space<vmem>>, vector<16x16xf32>
    %c0_4 = arith.constant 0 : index
    %c0_5 = arith.constant 0 : index
    %3 = vector.load %arg2[%c0_4, %c0_5] : memref<16x16xf32, #tpu.memory_space<vmem>>, vector<16x16xf32>
    %c0_6 = arith.constant 0 : index
    %c0_7 = arith.constant 0 : index
    %4 = vector.load %arg7[%c0_6, %c0_7] : memref<16x32xf32, #tpu.memory_space<vmem>>, vector<1x32xf32>
    %c1 = arith.constant 1 : index
    %c0_8 = arith.constant 0 : index
    %5 = vector.load %arg7[%c1, %c0_8] : memref<16x32xf32, #tpu.memory_space<vmem>>, vector<1x32xf32>
    %cst = arith.constant dense<0.000000e+00> : vector<16xf32>
    %6 = vector.multi_reduction <add>, %0, %cst [1] : vector<16x32xf32> to vector<16xf32>
    %7 = vector.shape_cast %6 : vector<16xf32> to vector<16x1xf32>
    %cst_9 = arith.constant 3.200000e+01 : f32
    %8 = vector.broadcast %cst_9 : f32 to vector<16x1xf32>
    %9 = arith.divf %7, %8 : vector<16x1xf32>
    %10 = vector.broadcast %9 : vector<16x1xf32> to vector<16x32xf32>
    %11 = arith.subf %0, %10 : vector<16x32xf32>
    %12 = arith.mulf %11, %11 : vector<16x32xf32>
    %cst_10 = arith.constant dense<0.000000e+00> : vector<16xf32>
    %13 = vector.multi_reduction <add>, %12, %cst_10 [1] : vector<16x32xf32> to vector<16xf32>
    %14 = vector.shape_cast %13 : vector<16xf32> to vector<16x1xf32>
    %cst_11 = arith.constant 3.200000e+01 : f32
    %15 = vector.broadcast %cst_11 : f32 to vector<16x1xf32>
    %16 = arith.divf %14, %15 : vector<16x1xf32>
    %17 = vector.broadcast %9 : vector<16x1xf32> to vector<16x32xf32>
    %18 = arith.subf %0, %17 : vector<16x32xf32>
    %cst_12 = arith.constant 9.99999974E-6 : f32
    %19 = vector.broadcast %cst_12 : f32 to vector<16x1xf32>
    %20 = arith.addf %16, %19 : vector<16x1xf32>
    %21 = math.rsqrt %20 : vector<16x1xf32>
    %22 = vector.broadcast %21 : vector<16x1xf32> to vector<16x32xf32>
    %23 = arith.mulf %18, %22 : vector<16x32xf32>
    %24 = vector.broadcast %4 : vector<1x32xf32> to vector<16x32xf32>
    %25 = arith.mulf %23, %24 : vector<16x32xf32>
    %26 = vector.broadcast %5 : vector<1x32xf32> to vector<16x32xf32>
    %27 = arith.addf %25, %26 : vector<16x32xf32>
    %c0_13 = arith.constant 0 : index
    %c0_14 = arith.constant 0 : index
    %c0_15 = arith.constant 0 : index
    %28 = vector.load %arg5[%c0_13, %c0_14, %c0_15] : memref<2x33x320xf32, #tpu.memory_space<vmem>>, vector<1x33x320xf32>
    %29 = vector.shape_cast %28 : vector<1x33x320xf32> to vector<33x320xf32>
    %30 = vector.extract_strided_slice %29 {offsets = [0, 0], sizes = [32, 320], strides = [1, 1]} : vector<33x320xf32> to vector<32x320xf32>
    %31 = vector.extract_strided_slice %29 {offsets = [32, 0], sizes = [1, 320], strides = [1, 1]} : vector<33x320xf32> to vector<1x320xf32>
    %32 = vector.extract_strided_slice %30 {offsets = [0, 0], sizes = [32, 96], strides = [1, 1]} : vector<32x320xf32> to vector<32x96xf32>
    %cst_16 = arith.constant dense<0.000000e+00> : vector<16x96xf32>
    %33 = tpu.matmul %27, %32, %cst_16 {dimension_numbers = #tpu.dot_dimension_numbers<[1], [0], [0], [1], [0, 0, 1, 1], [], []>} : vector<16x32xf32>, vector<32x96xf32>, vector<16x96xf32> -> vector<16x96xf32>
    %34 = vector.extract_strided_slice %31 {offsets = [0, 0], sizes = [1, 96], strides = [1, 1]} : vector<1x320xf32> to vector<1x96xf32>
    %35 = vector.broadcast %34 : vector<1x96xf32> to vector<16x96xf32>
    %36 = arith.addf %33, %35 : vector<16x96xf32>
    %37 = vector.extract_strided_slice %30 {offsets = [0, 96], sizes = [32, 32], strides = [1, 1]} : vector<32x320xf32> to vector<32x32xf32>
    %38 = vector.extract_strided_slice %36 {offsets = [0, 0], sizes = [16, 16], strides = [1, 1]} : vector<16x96xf32> to vector<16x16xf32>
    %39 = vector.extract_strided_slice %36 {offsets = [0, 32], sizes = [16, 16], strides = [1, 1]} : vector<16x96xf32> to vector<16x16xf32>
    %40 = vector.extract_strided_slice %36 {offsets = [0, 64], sizes = [16, 16], strides = [1, 1]} : vector<16x96xf32> to vector<16x16xf32>
    %cst_17 = arith.constant dense<0.000000e+00> : vector<16x16xf32>
    %41 = tpu.matmul %38, %39, %cst_17 {dimension_numbers = #tpu.dot_dimension_numbers<[1], [1], [0], [0], [0, 0, 1, 0], [], []>} : vector<16x16xf32>, vector<16x16xf32>, vector<16x16xf32> -> vector<16x16xf32>
    %cst_18 = arith.constant 2.500000e-01 : f32
    %42 = vector.broadcast %cst_18 : f32 to vector<16x16xf32>
    %43 = arith.mulf %41, %42 : vector<16x16xf32>
    %44 = arith.addf %43, %2 : vector<16x16xf32>
    %cst_19 = arith.constant dense<0xFF800000> : vector<16xf32>
    %45 = vector.multi_reduction <maximumf>, %44, %cst_19 [1] : vector<16x16xf32> to vector<16xf32>
    %46 = vector.shape_cast %45 : vector<16xf32> to vector<16x1xf32>
    %47 = vector.broadcast %46 : vector<16x1xf32> to vector<16x16xf32>
    %48 = arith.subf %44, %47 : vector<16x16xf32>
    %49 = math.exp %48 : vector<16x16xf32>
    %cst_20 = arith.constant dense<0.000000e+00> : vector<16xf32>
    %50 = vector.multi_reduction <add>, %49, %cst_20 [1] : vector<16x16xf32> to vector<16xf32>
    %51 = vector.shape_cast %50 : vector<16xf32> to vector<16x1xf32>
    %cst_21 = arith.constant dense<0.000000e+00> : vector<16x16xf32>
    %52 = tpu.matmul %49, %40, %cst_21 {dimension_numbers = #tpu.dot_dimension_numbers<[1], [0], [0], [1], [0, 0, 1, 1], [], []>} : vector<16x16xf32>, vector<16x16xf32>, vector<16x16xf32> -> vector<16x16xf32>
    %53 = tpu.reciprocal %51 {approx = true} : vector<16x1xf32> -> vector<16x1xf32>
    %54 = vector.broadcast %53 : vector<16x1xf32> to vector<16x16xf32>
    %55 = arith.mulf %52, %54 : vector<16x16xf32>
    %56 = vector.extract_strided_slice %37 {offsets = [0, 0], sizes = [16, 32], strides = [1, 1]} : vector<32x32xf32> to vector<16x32xf32>
    %cst_22 = arith.constant dense<0.000000e+00> : vector<16x32xf32>
    %57 = tpu.matmul %55, %56, %cst_22 {dimension_numbers = #tpu.dot_dimension_numbers<[1], [0], [0], [1], [0, 0, 1, 1], [], []>} : vector<16x16xf32>, vector<16x32xf32>, vector<16x32xf32> -> vector<16x32xf32>
    %58 = vector.extract_strided_slice %36 {offsets = [0, 16], sizes = [16, 16], strides = [1, 1]} : vector<16x96xf32> to vector<16x16xf32>
    %59 = vector.extract_strided_slice %36 {offsets = [0, 48], sizes = [16, 16], strides = [1, 1]} : vector<16x96xf32> to vector<16x16xf32>
    %60 = vector.extract_strided_slice %36 {offsets = [0, 80], sizes = [16, 16], strides = [1, 1]} : vector<16x96xf32> to vector<16x16xf32>
    %cst_23 = arith.constant dense<0.000000e+00> : vector<16x16xf32>
    %61 = tpu.matmul %58, %59, %cst_23 {dimension_numbers = #tpu.dot_dimension_numbers<[1], [1], [0], [0], [0, 0, 1, 0], [], []>} : vector<16x16xf32>, vector<16x16xf32>, vector<16x16xf32> -> vector<16x16xf32>
    %cst_24 = arith.constant 2.500000e-01 : f32
    %62 = vector.broadcast %cst_24 : f32 to vector<16x16xf32>
    %63 = arith.mulf %61, %62 : vector<16x16xf32>
    %64 = arith.addf %63, %2 : vector<16x16xf32>
    %cst_25 = arith.constant dense<0xFF800000> : vector<16xf32>
    %65 = vector.multi_reduction <maximumf>, %64, %cst_25 [1] : vector<16x16xf32> to vector<16xf32>
    %66 = vector.shape_cast %65 : vector<16xf32> to vector<16x1xf32>
    %67 = vector.broadcast %66 : vector<16x1xf32> to vector<16x16xf32>
    %68 = arith.subf %64, %67 : vector<16x16xf32>
    %69 = math.exp %68 : vector<16x16xf32>
    %cst_26 = arith.constant dense<0.000000e+00> : vector<16xf32>
    %70 = vector.multi_reduction <add>, %69, %cst_26 [1] : vector<16x16xf32> to vector<16xf32>
    %71 = vector.shape_cast %70 : vector<16xf32> to vector<16x1xf32>
    %cst_27 = arith.constant dense<0.000000e+00> : vector<16x16xf32>
    %72 = tpu.matmul %69, %60, %cst_27 {dimension_numbers = #tpu.dot_dimension_numbers<[1], [0], [0], [1], [0, 0, 1, 1], [], []>} : vector<16x16xf32>, vector<16x16xf32>, vector<16x16xf32> -> vector<16x16xf32>
    %73 = tpu.reciprocal %71 {approx = true} : vector<16x1xf32> -> vector<16x1xf32>
    %74 = vector.broadcast %73 : vector<16x1xf32> to vector<16x16xf32>
    %75 = arith.mulf %72, %74 : vector<16x16xf32>
    %76 = vector.extract_strided_slice %37 {offsets = [16, 0], sizes = [16, 32], strides = [1, 1]} : vector<32x32xf32> to vector<16x32xf32>
    %cst_28 = arith.constant dense<0.000000e+00> : vector<16x32xf32>
    %77 = tpu.matmul %75, %76, %cst_28 {dimension_numbers = #tpu.dot_dimension_numbers<[1], [0], [0], [1], [0, 0, 1, 1], [], []>} : vector<16x16xf32>, vector<16x32xf32>, vector<16x32xf32> -> vector<16x32xf32>
    %78 = arith.addf %57, %77 : vector<16x32xf32>
    %79 = vector.extract_strided_slice %31 {offsets = [0, 96], sizes = [1, 32], strides = [1, 1]} : vector<1x320xf32> to vector<1x32xf32>
    %80 = vector.broadcast %79 : vector<1x32xf32> to vector<16x32xf32>
    %81 = arith.addf %78, %80 : vector<16x32xf32>
    %82 = arith.addf %27, %81 : vector<16x32xf32>
    %c2 = arith.constant 2 : index
    %c0_29 = arith.constant 0 : index
    %83 = vector.load %arg7[%c2, %c0_29] : memref<16x32xf32, #tpu.memory_space<vmem>>, vector<1x32xf32>
    %c3 = arith.constant 3 : index
    %c0_30 = arith.constant 0 : index
    %84 = vector.load %arg7[%c3, %c0_30] : memref<16x32xf32, #tpu.memory_space<vmem>>, vector<1x32xf32>
    %cst_31 = arith.constant dense<0.000000e+00> : vector<16xf32>
    %85 = vector.multi_reduction <add>, %82, %cst_31 [1] : vector<16x32xf32> to vector<16xf32>
    %86 = vector.shape_cast %85 : vector<16xf32> to vector<16x1xf32>
    %cst_32 = arith.constant 3.200000e+01 : f32
    %87 = vector.broadcast %cst_32 : f32 to vector<16x1xf32>
    %88 = arith.divf %86, %87 : vector<16x1xf32>
    %89 = vector.broadcast %88 : vector<16x1xf32> to vector<16x32xf32>
    %90 = arith.subf %82, %89 : vector<16x32xf32>
    %91 = arith.mulf %90, %90 : vector<16x32xf32>
    %cst_33 = arith.constant dense<0.000000e+00> : vector<16xf32>
    %92 = vector.multi_reduction <add>, %91, %cst_33 [1] : vector<16x32xf32> to vector<16xf32>
    %93 = vector.shape_cast %92 : vector<16xf32> to vector<16x1xf32>
    %cst_34 = arith.constant 3.200000e+01 : f32
    %94 = vector.broadcast %cst_34 : f32 to vector<16x1xf32>
    %95 = arith.divf %93, %94 : vector<16x1xf32>
    %96 = vector.broadcast %88 : vector<16x1xf32> to vector<16x32xf32>
    %97 = arith.subf %82, %96 : vector<16x32xf32>
    %cst_35 = arith.constant 9.99999974E-6 : f32
    %98 = vector.broadcast %cst_35 : f32 to vector<16x1xf32>
    %99 = arith.addf %95, %98 : vector<16x1xf32>
    %100 = math.rsqrt %99 : vector<16x1xf32>
    %101 = vector.broadcast %100 : vector<16x1xf32> to vector<16x32xf32>
    %102 = arith.mulf %97, %101 : vector<16x32xf32>
    %103 = vector.broadcast %83 : vector<1x32xf32> to vector<16x32xf32>
    %104 = arith.mulf %102, %103 : vector<16x32xf32>
    %105 = vector.broadcast %84 : vector<1x32xf32> to vector<16x32xf32>
    %106 = arith.addf %104, %105 : vector<16x32xf32>
    %107 = vector.extract_strided_slice %30 {offsets = [0, 128], sizes = [32, 32], strides = [1, 1]} : vector<32x320xf32> to vector<32x32xf32>
    %cst_36 = arith.constant dense<0.000000e+00> : vector<16x32xf32>
    %108 = tpu.matmul %106, %107, %cst_36 {dimension_numbers = #tpu.dot_dimension_numbers<[1], [0], [0], [1], [0, 0, 1, 1], [], []>} : vector<16x32xf32>, vector<32x32xf32>, vector<16x32xf32> -> vector<16x32xf32>
    %109 = vector.extract_strided_slice %31 {offsets = [0, 128], sizes = [1, 32], strides = [1, 1]} : vector<1x320xf32> to vector<1x32xf32>
    %110 = vector.broadcast %109 : vector<1x32xf32> to vector<16x32xf32>
    %111 = arith.addf %108, %110 : vector<16x32xf32>
    %112 = vector.extract_strided_slice %30 {offsets = [0, 160], sizes = [32, 64], strides = [1, 1]} : vector<32x320xf32> to vector<32x64xf32>
    %cst_37 = arith.constant dense<0.000000e+00> : vector<16x64xf32>
    %113 = tpu.matmul %1, %112, %cst_37 {dimension_numbers = #tpu.dot_dimension_numbers<[1], [0], [0], [1], [0, 0, 1, 1], [], []>} : vector<16x32xf32>, vector<32x64xf32>, vector<16x64xf32> -> vector<16x64xf32>
    %114 = vector.extract_strided_slice %31 {offsets = [0, 160], sizes = [1, 64], strides = [1, 1]} : vector<1x320xf32> to vector<1x64xf32>
    %115 = vector.broadcast %114 : vector<1x64xf32> to vector<16x64xf32>
    %116 = arith.addf %113, %115 : vector<16x64xf32>
    %117 = vector.extract_strided_slice %30 {offsets = [0, 224], sizes = [32, 32], strides = [1, 1]} : vector<32x320xf32> to vector<32x32xf32>
    %118 = vector.extract_strided_slice %111 {offsets = [0, 0], sizes = [16, 16], strides = [1, 1]} : vector<16x32xf32> to vector<16x16xf32>
    %119 = vector.extract_strided_slice %116 {offsets = [0, 0], sizes = [16, 16], strides = [1, 1]} : vector<16x64xf32> to vector<16x16xf32>
    %120 = vector.extract_strided_slice %116 {offsets = [0, 32], sizes = [16, 16], strides = [1, 1]} : vector<16x64xf32> to vector<16x16xf32>
    %cst_38 = arith.constant dense<0.000000e+00> : vector<16x16xf32>
    %121 = tpu.matmul %118, %119, %cst_38 {dimension_numbers = #tpu.dot_dimension_numbers<[1], [1], [0], [0], [0, 0, 1, 0], [], []>} : vector<16x16xf32>, vector<16x16xf32>, vector<16x16xf32> -> vector<16x16xf32>
    %cst_39 = arith.constant 2.500000e-01 : f32
    %122 = vector.broadcast %cst_39 : f32 to vector<16x16xf32>
    %123 = arith.mulf %121, %122 : vector<16x16xf32>
    %124 = arith.addf %123, %3 : vector<16x16xf32>
    %cst_40 = arith.constant dense<0xFF800000> : vector<16xf32>
    %125 = vector.multi_reduction <maximumf>, %124, %cst_40 [1] : vector<16x16xf32> to vector<16xf32>
    %126 = vector.shape_cast %125 : vector<16xf32> to vector<16x1xf32>
    %127 = vector.broadcast %126 : vector<16x1xf32> to vector<16x16xf32>
    %128 = arith.subf %124, %127 : vector<16x16xf32>
    %129 = math.exp %128 : vector<16x16xf32>
    %cst_41 = arith.constant dense<0.000000e+00> : vector<16xf32>
    %130 = vector.multi_reduction <add>, %129, %cst_41 [1] : vector<16x16xf32> to vector<16xf32>
    %131 = vector.shape_cast %130 : vector<16xf32> to vector<16x1xf32>
    %cst_42 = arith.constant dense<0.000000e+00> : vector<16x16xf32>
    %132 = tpu.matmul %129, %120, %cst_42 {dimension_numbers = #tpu.dot_dimension_numbers<[1], [0], [0], [1], [0, 0, 1, 1], [], []>} : vector<16x16xf32>, vector<16x16xf32>, vector<16x16xf32> -> vector<16x16xf32>
    %133 = tpu.reciprocal %131 {approx = true} : vector<16x1xf32> -> vector<16x1xf32>
    %134 = vector.broadcast %133 : vector<16x1xf32> to vector<16x16xf32>
    %135 = arith.mulf %132, %134 : vector<16x16xf32>
    %136 = vector.extract_strided_slice %117 {offsets = [0, 0], sizes = [16, 32], strides = [1, 1]} : vector<32x32xf32> to vector<16x32xf32>
    %cst_43 = arith.constant dense<0.000000e+00> : vector<16x32xf32>
    %137 = tpu.matmul %135, %136, %cst_43 {dimension_numbers = #tpu.dot_dimension_numbers<[1], [0], [0], [1], [0, 0, 1, 1], [], []>} : vector<16x16xf32>, vector<16x32xf32>, vector<16x32xf32> -> vector<16x32xf32>
    %138 = vector.extract_strided_slice %111 {offsets = [0, 16], sizes = [16, 16], strides = [1, 1]} : vector<16x32xf32> to vector<16x16xf32>
    %139 = vector.extract_strided_slice %116 {offsets = [0, 16], sizes = [16, 16], strides = [1, 1]} : vector<16x64xf32> to vector<16x16xf32>
    %140 = vector.extract_strided_slice %116 {offsets = [0, 48], sizes = [16, 16], strides = [1, 1]} : vector<16x64xf32> to vector<16x16xf32>
    %cst_44 = arith.constant dense<0.000000e+00> : vector<16x16xf32>
    %141 = tpu.matmul %138, %139, %cst_44 {dimension_numbers = #tpu.dot_dimension_numbers<[1], [1], [0], [0], [0, 0, 1, 0], [], []>} : vector<16x16xf32>, vector<16x16xf32>, vector<16x16xf32> -> vector<16x16xf32>
    %cst_45 = arith.constant 2.500000e-01 : f32
    %142 = vector.broadcast %cst_45 : f32 to vector<16x16xf32>
    %143 = arith.mulf %141, %142 : vector<16x16xf32>
    %144 = arith.addf %143, %3 : vector<16x16xf32>
    %cst_46 = arith.constant dense<0xFF800000> : vector<16xf32>
    %145 = vector.multi_reduction <maximumf>, %144, %cst_46 [1] : vector<16x16xf32> to vector<16xf32>
    %146 = vector.shape_cast %145 : vector<16xf32> to vector<16x1xf32>
    %147 = vector.broadcast %146 : vector<16x1xf32> to vector<16x16xf32>
    %148 = arith.subf %144, %147 : vector<16x16xf32>
    %149 = math.exp %148 : vector<16x16xf32>
    %cst_47 = arith.constant dense<0.000000e+00> : vector<16xf32>
    %150 = vector.multi_reduction <add>, %149, %cst_47 [1] : vector<16x16xf32> to vector<16xf32>
    %151 = vector.shape_cast %150 : vector<16xf32> to vector<16x1xf32>
    %cst_48 = arith.constant dense<0.000000e+00> : vector<16x16xf32>
    %152 = tpu.matmul %149, %140, %cst_48 {dimension_numbers = #tpu.dot_dimension_numbers<[1], [0], [0], [1], [0, 0, 1, 1], [], []>} : vector<16x16xf32>, vector<16x16xf32>, vector<16x16xf32> -> vector<16x16xf32>
    %153 = tpu.reciprocal %151 {approx = true} : vector<16x1xf32> -> vector<16x1xf32>
    %154 = vector.broadcast %153 : vector<16x1xf32> to vector<16x16xf32>
    %155 = arith.mulf %152, %154 : vector<16x16xf32>
    %156 = vector.extract_strided_slice %117 {offsets = [16, 0], sizes = [16, 32], strides = [1, 1]} : vector<32x32xf32> to vector<16x32xf32>
    %cst_49 = arith.constant dense<0.000000e+00> : vector<16x32xf32>
    %157 = tpu.matmul %155, %156, %cst_49 {dimension_numbers = #tpu.dot_dimension_numbers<[1], [0], [0], [1], [0, 0, 1, 1], [], []>} : vector<16x16xf32>, vector<16x32xf32>, vector<16x32xf32> -> vector<16x32xf32>
    %158 = arith.addf %137, %157 : vector<16x32xf32>
    %159 = vector.extract_strided_slice %31 {offsets = [0, 224], sizes = [1, 32], strides = [1, 1]} : vector<1x320xf32> to vector<1x32xf32>
    %160 = vector.broadcast %159 : vector<1x32xf32> to vector<16x32xf32>
    %161 = arith.addf %158, %160 : vector<16x32xf32>
    %162 = arith.addf %106, %161 : vector<16x32xf32>
    %c4 = arith.constant 4 : index
    %c0_50 = arith.constant 0 : index
    %163 = vector.load %arg7[%c4, %c0_50] : memref<16x32xf32, #tpu.memory_space<vmem>>, vector<1x32xf32>
    %c5 = arith.constant 5 : index
    %c0_51 = arith.constant 0 : index
    %164 = vector.load %arg7[%c5, %c0_51] : memref<16x32xf32, #tpu.memory_space<vmem>>, vector<1x32xf32>
    %cst_52 = arith.constant dense<0.000000e+00> : vector<16xf32>
    %165 = vector.multi_reduction <add>, %162, %cst_52 [1] : vector<16x32xf32> to vector<16xf32>
    %166 = vector.shape_cast %165 : vector<16xf32> to vector<16x1xf32>
    %cst_53 = arith.constant 3.200000e+01 : f32
    %167 = vector.broadcast %cst_53 : f32 to vector<16x1xf32>
    %168 = arith.divf %166, %167 : vector<16x1xf32>
    %169 = vector.broadcast %168 : vector<16x1xf32> to vector<16x32xf32>
    %170 = arith.subf %162, %169 : vector<16x32xf32>
    %171 = arith.mulf %170, %170 : vector<16x32xf32>
    %cst_54 = arith.constant dense<0.000000e+00> : vector<16xf32>
    %172 = vector.multi_reduction <add>, %171, %cst_54 [1] : vector<16x32xf32> to vector<16xf32>
    %173 = vector.shape_cast %172 : vector<16xf32> to vector<16x1xf32>
    %cst_55 = arith.constant 3.200000e+01 : f32
    %174 = vector.broadcast %cst_55 : f32 to vector<16x1xf32>
    %175 = arith.divf %173, %174 : vector<16x1xf32>
    %176 = vector.broadcast %168 : vector<16x1xf32> to vector<16x32xf32>
    %177 = arith.subf %162, %176 : vector<16x32xf32>
    %cst_56 = arith.constant 9.99999974E-6 : f32
    %178 = vector.broadcast %cst_56 : f32 to vector<16x1xf32>
    %179 = arith.addf %175, %178 : vector<16x1xf32>
    %180 = math.rsqrt %179 : vector<16x1xf32>
    %181 = vector.broadcast %180 : vector<16x1xf32> to vector<16x32xf32>
    %182 = arith.mulf %177, %181 : vector<16x32xf32>
    %183 = vector.broadcast %163 : vector<1x32xf32> to vector<16x32xf32>
    %184 = arith.mulf %182, %183 : vector<16x32xf32>
    %185 = vector.broadcast %164 : vector<1x32xf32> to vector<16x32xf32>
    %186 = arith.addf %184, %185 : vector<16x32xf32>
    %187 = vector.extract_strided_slice %30 {offsets = [0, 256], sizes = [32, 64], strides = [1, 1]} : vector<32x320xf32> to vector<32x64xf32>
    %cst_57 = arith.constant dense<0.000000e+00> : vector<16x64xf32>
    %188 = tpu.matmul %186, %187, %cst_57 {dimension_numbers = #tpu.dot_dimension_numbers<[1], [0], [0], [1], [0, 0, 1, 1], [], []>} : vector<16x32xf32>, vector<32x64xf32>, vector<16x64xf32> -> vector<16x64xf32>
    %189 = vector.extract_strided_slice %31 {offsets = [0, 256], sizes = [1, 64], strides = [1, 1]} : vector<1x320xf32> to vector<1x64xf32>
    %190 = vector.broadcast %189 : vector<1x64xf32> to vector<16x64xf32>
    %191 = arith.addf %188, %190 : vector<16x64xf32>
    %192 = arith.mulf %191, %191 : vector<16x64xf32>
    %193 = arith.mulf %191, %192 : vector<16x64xf32>
    %cst_58 = arith.constant 4.471500e-02 : f32
    %194 = vector.broadcast %cst_58 : f32 to vector<16x64xf32>
    %195 = arith.mulf %194, %193 : vector<16x64xf32>
    %196 = arith.addf %191, %195 : vector<16x64xf32>
    %cst_59 = arith.constant 0.797884583 : f32
    %197 = vector.broadcast %cst_59 : f32 to vector<16x64xf32>
    %198 = arith.mulf %197, %196 : vector<16x64xf32>
    %199 = math.tanh %198 : vector<16x64xf32>
    %cst_60 = arith.constant 1.000000e+00 : f32
    %200 = vector.broadcast %cst_60 : f32 to vector<16x64xf32>
    %201 = arith.addf %200, %199 : vector<16x64xf32>
    %cst_61 = arith.constant 5.000000e-01 : f32
    %202 = vector.broadcast %cst_61 : f32 to vector<16x64xf32>
    %203 = arith.mulf %202, %201 : vector<16x64xf32>
    %204 = arith.mulf %191, %203 : vector<16x64xf32>
    %c0_62 = arith.constant 0 : index
    %c0_63 = arith.constant 0 : index
    %c0_64 = arith.constant 0 : index
    %205 = vector.load %arg6[%c0_62, %c0_63, %c0_64] : memref<2x64x32xf32, #tpu.memory_space<vmem>>, vector<1x64x32xf32>
    %206 = vector.shape_cast %205 : vector<1x64x32xf32> to vector<64x32xf32>
    %cst_65 = arith.constant dense<0.000000e+00> : vector<16x32xf32>
    %207 = tpu.matmul %204, %206, %cst_65 {dimension_numbers = #tpu.dot_dimension_numbers<[1], [0], [0], [1], [0, 0, 1, 1], [], []>} : vector<16x64xf32>, vector<64x32xf32>, vector<16x32xf32> -> vector<16x32xf32>
    %c8 = arith.constant 8 : index
    %c0_66 = arith.constant 0 : index
    %208 = vector.load %arg7[%c8, %c0_66] : memref<16x32xf32, #tpu.memory_space<vmem>>, vector<1x32xf32>
    %209 = vector.broadcast %208 : vector<1x32xf32> to vector<16x32xf32>
    %210 = arith.addf %207, %209 : vector<16x32xf32>
    %211 = arith.addf %186, %210 : vector<16x32xf32>
    %c6 = arith.constant 6 : index
    %c0_67 = arith.constant 0 : index
    %212 = vector.load %arg7[%c6, %c0_67] : memref<16x32xf32, #tpu.memory_space<vmem>>, vector<1x32xf32>
    %c7 = arith.constant 7 : index
    %c0_68 = arith.constant 0 : index
    %213 = vector.load %arg7[%c7, %c0_68] : memref<16x32xf32, #tpu.memory_space<vmem>>, vector<1x32xf32>
    %cst_69 = arith.constant dense<0.000000e+00> : vector<16xf32>
    %214 = vector.multi_reduction <add>, %211, %cst_69 [1] : vector<16x32xf32> to vector<16xf32>
    %215 = vector.shape_cast %214 : vector<16xf32> to vector<16x1xf32>
    %cst_70 = arith.constant 3.200000e+01 : f32
    %216 = vector.broadcast %cst_70 : f32 to vector<16x1xf32>
    %217 = arith.divf %215, %216 : vector<16x1xf32>
    %218 = vector.broadcast %217 : vector<16x1xf32> to vector<16x32xf32>
    %219 = arith.subf %211, %218 : vector<16x32xf32>
    %220 = arith.mulf %219, %219 : vector<16x32xf32>
    %cst_71 = arith.constant dense<0.000000e+00> : vector<16xf32>
    %221 = vector.multi_reduction <add>, %220, %cst_71 [1] : vector<16x32xf32> to vector<16xf32>
    %222 = vector.shape_cast %221 : vector<16xf32> to vector<16x1xf32>
    %cst_72 = arith.constant 3.200000e+01 : f32
    %223 = vector.broadcast %cst_72 : f32 to vector<16x1xf32>
    %224 = arith.divf %222, %223 : vector<16x1xf32>
    %225 = vector.broadcast %217 : vector<16x1xf32> to vector<16x32xf32>
    %226 = arith.subf %211, %225 : vector<16x32xf32>
    %cst_73 = arith.constant 9.99999974E-6 : f32
    %227 = vector.broadcast %cst_73 : f32 to vector<16x1xf32>
    %228 = arith.addf %224, %227 : vector<16x1xf32>
    %229 = math.rsqrt %228 : vector<16x1xf32>
    %230 = vector.broadcast %229 : vector<16x1xf32> to vector<16x32xf32>
    %231 = arith.mulf %226, %230 : vector<16x32xf32>
    %232 = vector.broadcast %212 : vector<1x32xf32> to vector<16x32xf32>
    %233 = arith.mulf %231, %232 : vector<16x32xf32>
    %234 = vector.broadcast %213 : vector<1x32xf32> to vector<16x32xf32>
    %235 = arith.addf %233, %234 : vector<16x32xf32>
    %c1_74 = arith.constant 1 : index
    %c0_75 = arith.constant 0 : index
    %c0_76 = arith.constant 0 : index
    %236 = vector.load %arg5[%c1_74, %c0_75, %c0_76] : memref<2x33x320xf32, #tpu.memory_space<vmem>>, vector<1x33x320xf32>
    %237 = vector.shape_cast %236 : vector<1x33x320xf32> to vector<33x320xf32>
    %238 = vector.extract_strided_slice %237 {offsets = [0, 0], sizes = [32, 320], strides = [1, 1]} : vector<33x320xf32> to vector<32x320xf32>
    %239 = vector.extract_strided_slice %237 {offsets = [32, 0], sizes = [1, 320], strides = [1, 1]} : vector<33x320xf32> to vector<1x320xf32>
    %240 = vector.extract_strided_slice %238 {offsets = [0, 0], sizes = [32, 96], strides = [1, 1]} : vector<32x320xf32> to vector<32x96xf32>
    %cst_77 = arith.constant dense<0.000000e+00> : vector<16x96xf32>
    %241 = tpu.matmul %235, %240, %cst_77 {dimension_numbers = #tpu.dot_dimension_numbers<[1], [0], [0], [1], [0, 0, 1, 1], [], []>} : vector<16x32xf32>, vector<32x96xf32>, vector<16x96xf32> -> vector<16x96xf32>
    %242 = vector.extract_strided_slice %239 {offsets = [0, 0], sizes = [1, 96], strides = [1, 1]} : vector<1x320xf32> to vector<1x96xf32>
    %243 = vector.broadcast %242 : vector<1x96xf32> to vector<16x96xf32>
    %244 = arith.addf %241, %243 : vector<16x96xf32>
    %245 = vector.extract_strided_slice %238 {offsets = [0, 96], sizes = [32, 32], strides = [1, 1]} : vector<32x320xf32> to vector<32x32xf32>
    %246 = vector.extract_strided_slice %244 {offsets = [0, 0], sizes = [16, 16], strides = [1, 1]} : vector<16x96xf32> to vector<16x16xf32>
    %247 = vector.extract_strided_slice %244 {offsets = [0, 32], sizes = [16, 16], strides = [1, 1]} : vector<16x96xf32> to vector<16x16xf32>
    %248 = vector.extract_strided_slice %244 {offsets = [0, 64], sizes = [16, 16], strides = [1, 1]} : vector<16x96xf32> to vector<16x16xf32>
    %cst_78 = arith.constant dense<0.000000e+00> : vector<16x16xf32>
    %249 = tpu.matmul %246, %247, %cst_78 {dimension_numbers = #tpu.dot_dimension_numbers<[1], [1], [0], [0], [0, 0, 1, 0], [], []>} : vector<16x16xf32>, vector<16x16xf32>, vector<16x16xf32> -> vector<16x16xf32>
    %cst_79 = arith.constant 2.500000e-01 : f32
    %250 = vector.broadcast %cst_79 : f32 to vector<16x16xf32>
    %251 = arith.mulf %249, %250 : vector<16x16xf32>
    %252 = arith.addf %251, %2 : vector<16x16xf32>
    %cst_80 = arith.constant dense<0xFF800000> : vector<16xf32>
    %253 = vector.multi_reduction <maximumf>, %252, %cst_80 [1] : vector<16x16xf32> to vector<16xf32>
    %254 = vector.shape_cast %253 : vector<16xf32> to vector<16x1xf32>
    %255 = vector.broadcast %254 : vector<16x1xf32> to vector<16x16xf32>
    %256 = arith.subf %252, %255 : vector<16x16xf32>
    %257 = math.exp %256 : vector<16x16xf32>
    %cst_81 = arith.constant dense<0.000000e+00> : vector<16xf32>
    %258 = vector.multi_reduction <add>, %257, %cst_81 [1] : vector<16x16xf32> to vector<16xf32>
    %259 = vector.shape_cast %258 : vector<16xf32> to vector<16x1xf32>
    %cst_82 = arith.constant dense<0.000000e+00> : vector<16x16xf32>
    %260 = tpu.matmul %257, %248, %cst_82 {dimension_numbers = #tpu.dot_dimension_numbers<[1], [0], [0], [1], [0, 0, 1, 1], [], []>} : vector<16x16xf32>, vector<16x16xf32>, vector<16x16xf32> -> vector<16x16xf32>
    %261 = tpu.reciprocal %259 {approx = true} : vector<16x1xf32> -> vector<16x1xf32>
    %262 = vector.broadcast %261 : vector<16x1xf32> to vector<16x16xf32>
    %263 = arith.mulf %260, %262 : vector<16x16xf32>
    %264 = vector.extract_strided_slice %245 {offsets = [0, 0], sizes = [16, 32], strides = [1, 1]} : vector<32x32xf32> to vector<16x32xf32>
    %cst_83 = arith.constant dense<0.000000e+00> : vector<16x32xf32>
    %265 = tpu.matmul %263, %264, %cst_83 {dimension_numbers = #tpu.dot_dimension_numbers<[1], [0], [0], [1], [0, 0, 1, 1], [], []>} : vector<16x16xf32>, vector<16x32xf32>, vector<16x32xf32> -> vector<16x32xf32>
    %266 = vector.extract_strided_slice %244 {offsets = [0, 16], sizes = [16, 16], strides = [1, 1]} : vector<16x96xf32> to vector<16x16xf32>
    %267 = vector.extract_strided_slice %244 {offsets = [0, 48], sizes = [16, 16], strides = [1, 1]} : vector<16x96xf32> to vector<16x16xf32>
    %268 = vector.extract_strided_slice %244 {offsets = [0, 80], sizes = [16, 16], strides = [1, 1]} : vector<16x96xf32> to vector<16x16xf32>
    %cst_84 = arith.constant dense<0.000000e+00> : vector<16x16xf32>
    %269 = tpu.matmul %266, %267, %cst_84 {dimension_numbers = #tpu.dot_dimension_numbers<[1], [1], [0], [0], [0, 0, 1, 0], [], []>} : vector<16x16xf32>, vector<16x16xf32>, vector<16x16xf32> -> vector<16x16xf32>
    %cst_85 = arith.constant 2.500000e-01 : f32
    %270 = vector.broadcast %cst_85 : f32 to vector<16x16xf32>
    %271 = arith.mulf %269, %270 : vector<16x16xf32>
    %272 = arith.addf %271, %2 : vector<16x16xf32>
    %cst_86 = arith.constant dense<0xFF800000> : vector<16xf32>
    %273 = vector.multi_reduction <maximumf>, %272, %cst_86 [1] : vector<16x16xf32> to vector<16xf32>
    %274 = vector.shape_cast %273 : vector<16xf32> to vector<16x1xf32>
    %275 = vector.broadcast %274 : vector<16x1xf32> to vector<16x16xf32>
    %276 = arith.subf %272, %275 : vector<16x16xf32>
    %277 = math.exp %276 : vector<16x16xf32>
    %cst_87 = arith.constant dense<0.000000e+00> : vector<16xf32>
    %278 = vector.multi_reduction <add>, %277, %cst_87 [1] : vector<16x16xf32> to vector<16xf32>
    %279 = vector.shape_cast %278 : vector<16xf32> to vector<16x1xf32>
    %cst_88 = arith.constant dense<0.000000e+00> : vector<16x16xf32>
    %280 = tpu.matmul %277, %268, %cst_88 {dimension_numbers = #tpu.dot_dimension_numbers<[1], [0], [0], [1], [0, 0, 1, 1], [], []>} : vector<16x16xf32>, vector<16x16xf32>, vector<16x16xf32> -> vector<16x16xf32>
    %281 = tpu.reciprocal %279 {approx = true} : vector<16x1xf32> -> vector<16x1xf32>
    %282 = vector.broadcast %281 : vector<16x1xf32> to vector<16x16xf32>
    %283 = arith.mulf %280, %282 : vector<16x16xf32>
    %284 = vector.extract_strided_slice %245 {offsets = [16, 0], sizes = [16, 32], strides = [1, 1]} : vector<32x32xf32> to vector<16x32xf32>
    %cst_89 = arith.constant dense<0.000000e+00> : vector<16x32xf32>
    %285 = tpu.matmul %283, %284, %cst_89 {dimension_numbers = #tpu.dot_dimension_numbers<[1], [0], [0], [1], [0, 0, 1, 1], [], []>} : vector<16x16xf32>, vector<16x32xf32>, vector<16x32xf32> -> vector<16x32xf32>
    %286 = arith.addf %265, %285 : vector<16x32xf32>
    %287 = vector.extract_strided_slice %239 {offsets = [0, 96], sizes = [1, 32], strides = [1, 1]} : vector<1x320xf32> to vector<1x32xf32>
    %288 = vector.broadcast %287 : vector<1x32xf32> to vector<16x32xf32>
    %289 = arith.addf %286, %288 : vector<16x32xf32>
    %290 = arith.addf %235, %289 : vector<16x32xf32>
    %c9 = arith.constant 9 : index
    %c0_90 = arith.constant 0 : index
    %291 = vector.load %arg7[%c9, %c0_90] : memref<16x32xf32, #tpu.memory_space<vmem>>, vector<1x32xf32>
    %c10 = arith.constant 10 : index
    %c0_91 = arith.constant 0 : index
    %292 = vector.load %arg7[%c10, %c0_91] : memref<16x32xf32, #tpu.memory_space<vmem>>, vector<1x32xf32>
    %cst_92 = arith.constant dense<0.000000e+00> : vector<16xf32>
    %293 = vector.multi_reduction <add>, %290, %cst_92 [1] : vector<16x32xf32> to vector<16xf32>
    %294 = vector.shape_cast %293 : vector<16xf32> to vector<16x1xf32>
    %cst_93 = arith.constant 3.200000e+01 : f32
    %295 = vector.broadcast %cst_93 : f32 to vector<16x1xf32>
    %296 = arith.divf %294, %295 : vector<16x1xf32>
    %297 = vector.broadcast %296 : vector<16x1xf32> to vector<16x32xf32>
    %298 = arith.subf %290, %297 : vector<16x32xf32>
    %299 = arith.mulf %298, %298 : vector<16x32xf32>
    %cst_94 = arith.constant dense<0.000000e+00> : vector<16xf32>
    %300 = vector.multi_reduction <add>, %299, %cst_94 [1] : vector<16x32xf32> to vector<16xf32>
    %301 = vector.shape_cast %300 : vector<16xf32> to vector<16x1xf32>
    %cst_95 = arith.constant 3.200000e+01 : f32
    %302 = vector.broadcast %cst_95 : f32 to vector<16x1xf32>
    %303 = arith.divf %301, %302 : vector<16x1xf32>
    %304 = vector.broadcast %296 : vector<16x1xf32> to vector<16x32xf32>
    %305 = arith.subf %290, %304 : vector<16x32xf32>
    %cst_96 = arith.constant 9.99999974E-6 : f32
    %306 = vector.broadcast %cst_96 : f32 to vector<16x1xf32>
    %307 = arith.addf %303, %306 : vector<16x1xf32>
    %308 = math.rsqrt %307 : vector<16x1xf32>
    %309 = vector.broadcast %308 : vector<16x1xf32> to vector<16x32xf32>
    %310 = arith.mulf %305, %309 : vector<16x32xf32>
    %311 = vector.broadcast %291 : vector<1x32xf32> to vector<16x32xf32>
    %312 = arith.mulf %310, %311 : vector<16x32xf32>
    %313 = vector.broadcast %292 : vector<1x32xf32> to vector<16x32xf32>
    %314 = arith.addf %312, %313 : vector<16x32xf32>
    %315 = vector.extract_strided_slice %238 {offsets = [0, 128], sizes = [32, 32], strides = [1, 1]} : vector<32x320xf32> to vector<32x32xf32>
    %cst_97 = arith.constant dense<0.000000e+00> : vector<16x32xf32>
    %316 = tpu.matmul %314, %315, %cst_97 {dimension_numbers = #tpu.dot_dimension_numbers<[1], [0], [0], [1], [0, 0, 1, 1], [], []>} : vector<16x32xf32>, vector<32x32xf32>, vector<16x32xf32> -> vector<16x32xf32>
    %317 = vector.extract_strided_slice %239 {offsets = [0, 128], sizes = [1, 32], strides = [1, 1]} : vector<1x320xf32> to vector<1x32xf32>
    %318 = vector.broadcast %317 : vector<1x32xf32> to vector<16x32xf32>
    %319 = arith.addf %316, %318 : vector<16x32xf32>
    %320 = vector.extract_strided_slice %238 {offsets = [0, 160], sizes = [32, 64], strides = [1, 1]} : vector<32x320xf32> to vector<32x64xf32>
    %cst_98 = arith.constant dense<0.000000e+00> : vector<16x64xf32>
    %321 = tpu.matmul %1, %320, %cst_98 {dimension_numbers = #tpu.dot_dimension_numbers<[1], [0], [0], [1], [0, 0, 1, 1], [], []>} : vector<16x32xf32>, vector<32x64xf32>, vector<16x64xf32> -> vector<16x64xf32>
    %322 = vector.extract_strided_slice %239 {offsets = [0, 160], sizes = [1, 64], strides = [1, 1]} : vector<1x320xf32> to vector<1x64xf32>
    %323 = vector.broadcast %322 : vector<1x64xf32> to vector<16x64xf32>
    %324 = arith.addf %321, %323 : vector<16x64xf32>
    %325 = vector.extract_strided_slice %238 {offsets = [0, 224], sizes = [32, 32], strides = [1, 1]} : vector<32x320xf32> to vector<32x32xf32>
    %326 = vector.extract_strided_slice %319 {offsets = [0, 0], sizes = [16, 16], strides = [1, 1]} : vector<16x32xf32> to vector<16x16xf32>
    %327 = vector.extract_strided_slice %324 {offsets = [0, 0], sizes = [16, 16], strides = [1, 1]} : vector<16x64xf32> to vector<16x16xf32>
    %328 = vector.extract_strided_slice %324 {offsets = [0, 32], sizes = [16, 16], strides = [1, 1]} : vector<16x64xf32> to vector<16x16xf32>
    %cst_99 = arith.constant dense<0.000000e+00> : vector<16x16xf32>
    %329 = tpu.matmul %326, %327, %cst_99 {dimension_numbers = #tpu.dot_dimension_numbers<[1], [1], [0], [0], [0, 0, 1, 0], [], []>} : vector<16x16xf32>, vector<16x16xf32>, vector<16x16xf32> -> vector<16x16xf32>
    %cst_100 = arith.constant 2.500000e-01 : f32
    %330 = vector.broadcast %cst_100 : f32 to vector<16x16xf32>
    %331 = arith.mulf %329, %330 : vector<16x16xf32>
    %332 = arith.addf %331, %3 : vector<16x16xf32>
    %cst_101 = arith.constant dense<0xFF800000> : vector<16xf32>
    %333 = vector.multi_reduction <maximumf>, %332, %cst_101 [1] : vector<16x16xf32> to vector<16xf32>
    %334 = vector.shape_cast %333 : vector<16xf32> to vector<16x1xf32>
    %335 = vector.broadcast %334 : vector<16x1xf32> to vector<16x16xf32>
    %336 = arith.subf %332, %335 : vector<16x16xf32>
    %337 = math.exp %336 : vector<16x16xf32>
    %cst_102 = arith.constant dense<0.000000e+00> : vector<16xf32>
    %338 = vector.multi_reduction <add>, %337, %cst_102 [1] : vector<16x16xf32> to vector<16xf32>
    %339 = vector.shape_cast %338 : vector<16xf32> to vector<16x1xf32>
    %cst_103 = arith.constant dense<0.000000e+00> : vector<16x16xf32>
    %340 = tpu.matmul %337, %328, %cst_103 {dimension_numbers = #tpu.dot_dimension_numbers<[1], [0], [0], [1], [0, 0, 1, 1], [], []>} : vector<16x16xf32>, vector<16x16xf32>, vector<16x16xf32> -> vector<16x16xf32>
    %341 = tpu.reciprocal %339 {approx = true} : vector<16x1xf32> -> vector<16x1xf32>
    %342 = vector.broadcast %341 : vector<16x1xf32> to vector<16x16xf32>
    %343 = arith.mulf %340, %342 : vector<16x16xf32>
    %344 = vector.extract_strided_slice %325 {offsets = [0, 0], sizes = [16, 32], strides = [1, 1]} : vector<32x32xf32> to vector<16x32xf32>
    %cst_104 = arith.constant dense<0.000000e+00> : vector<16x32xf32>
    %345 = tpu.matmul %343, %344, %cst_104 {dimension_numbers = #tpu.dot_dimension_numbers<[1], [0], [0], [1], [0, 0, 1, 1], [], []>} : vector<16x16xf32>, vector<16x32xf32>, vector<16x32xf32> -> vector<16x32xf32>
    %346 = vector.extract_strided_slice %319 {offsets = [0, 16], sizes = [16, 16], strides = [1, 1]} : vector<16x32xf32> to vector<16x16xf32>
    %347 = vector.extract_strided_slice %324 {offsets = [0, 16], sizes = [16, 16], strides = [1, 1]} : vector<16x64xf32> to vector<16x16xf32>
    %348 = vector.extract_strided_slice %324 {offsets = [0, 48], sizes = [16, 16], strides = [1, 1]} : vector<16x64xf32> to vector<16x16xf32>
    %cst_105 = arith.constant dense<0.000000e+00> : vector<16x16xf32>
    %349 = tpu.matmul %346, %347, %cst_105 {dimension_numbers = #tpu.dot_dimension_numbers<[1], [1], [0], [0], [0, 0, 1, 0], [], []>} : vector<16x16xf32>, vector<16x16xf32>, vector<16x16xf32> -> vector<16x16xf32>
    %cst_106 = arith.constant 2.500000e-01 : f32
    %350 = vector.broadcast %cst_106 : f32 to vector<16x16xf32>
    %351 = arith.mulf %349, %350 : vector<16x16xf32>
    %352 = arith.addf %351, %3 : vector<16x16xf32>
    %cst_107 = arith.constant dense<0xFF800000> : vector<16xf32>
    %353 = vector.multi_reduction <maximumf>, %352, %cst_107 [1] : vector<16x16xf32> to vector<16xf32>
    %354 = vector.shape_cast %353 : vector<16xf32> to vector<16x1xf32>
    %355 = vector.broadcast %354 : vector<16x1xf32> to vector<16x16xf32>
    %356 = arith.subf %352, %355 : vector<16x16xf32>
    %357 = math.exp %356 : vector<16x16xf32>
    %cst_108 = arith.constant dense<0.000000e+00> : vector<16xf32>
    %358 = vector.multi_reduction <add>, %357, %cst_108 [1] : vector<16x16xf32> to vector<16xf32>
    %359 = vector.shape_cast %358 : vector<16xf32> to vector<16x1xf32>
    %cst_109 = arith.constant dense<0.000000e+00> : vector<16x16xf32>
    %360 = tpu.matmul %357, %348, %cst_109 {dimension_numbers = #tpu.dot_dimension_numbers<[1], [0], [0], [1], [0, 0, 1, 1], [], []>} : vector<16x16xf32>, vector<16x16xf32>, vector<16x16xf32> -> vector<16x16xf32>
    %361 = tpu.reciprocal %359 {approx = true} : vector<16x1xf32> -> vector<16x1xf32>
    %362 = vector.broadcast %361 : vector<16x1xf32> to vector<16x16xf32>
    %363 = arith.mulf %360, %362 : vector<16x16xf32>
    %364 = vector.extract_strided_slice %325 {offsets = [16, 0], sizes = [16, 32], strides = [1, 1]} : vector<32x32xf32> to vector<16x32xf32>
    %cst_110 = arith.constant dense<0.000000e+00> : vector<16x32xf32>
    %365 = tpu.matmul %363, %364, %cst_110 {dimension_numbers = #tpu.dot_dimension_numbers<[1], [0], [0], [1], [0, 0, 1, 1], [], []>} : vector<16x16xf32>, vector<16x32xf32>, vector<16x32xf32> -> vector<16x32xf32>
    %366 = arith.addf %345, %365 : vector<16x32xf32>
    %367 = vector.extract_strided_slice %239 {offsets = [0, 224], sizes = [1, 32], strides = [1, 1]} : vector<1x320xf32> to vector<1x32xf32>
    %368 = vector.broadcast %367 : vector<1x32xf32> to vector<16x32xf32>
    %369 = arith.addf %366, %368 : vector<16x32xf32>
    %370 = arith.addf %314, %369 : vector<16x32xf32>
    %c11 = arith.constant 11 : index
    %c0_111 = arith.constant 0 : index
    %371 = vector.load %arg7[%c11, %c0_111] : memref<16x32xf32, #tpu.memory_space<vmem>>, vector<1x32xf32>
    %c12 = arith.constant 12 : index
    %c0_112 = arith.constant 0 : index
    %372 = vector.load %arg7[%c12, %c0_112] : memref<16x32xf32, #tpu.memory_space<vmem>>, vector<1x32xf32>
    %cst_113 = arith.constant dense<0.000000e+00> : vector<16xf32>
    %373 = vector.multi_reduction <add>, %370, %cst_113 [1] : vector<16x32xf32> to vector<16xf32>
    %374 = vector.shape_cast %373 : vector<16xf32> to vector<16x1xf32>
    %cst_114 = arith.constant 3.200000e+01 : f32
    %375 = vector.broadcast %cst_114 : f32 to vector<16x1xf32>
    %376 = arith.divf %374, %375 : vector<16x1xf32>
    %377 = vector.broadcast %376 : vector<16x1xf32> to vector<16x32xf32>
    %378 = arith.subf %370, %377 : vector<16x32xf32>
    %379 = arith.mulf %378, %378 : vector<16x32xf32>
    %cst_115 = arith.constant dense<0.000000e+00> : vector<16xf32>
    %380 = vector.multi_reduction <add>, %379, %cst_115 [1] : vector<16x32xf32> to vector<16xf32>
    %381 = vector.shape_cast %380 : vector<16xf32> to vector<16x1xf32>
    %cst_116 = arith.constant 3.200000e+01 : f32
    %382 = vector.broadcast %cst_116 : f32 to vector<16x1xf32>
    %383 = arith.divf %381, %382 : vector<16x1xf32>
    %384 = vector.broadcast %376 : vector<16x1xf32> to vector<16x32xf32>
    %385 = arith.subf %370, %384 : vector<16x32xf32>
    %cst_117 = arith.constant 9.99999974E-6 : f32
    %386 = vector.broadcast %cst_117 : f32 to vector<16x1xf32>
    %387 = arith.addf %383, %386 : vector<16x1xf32>
    %388 = math.rsqrt %387 : vector<16x1xf32>
    %389 = vector.broadcast %388 : vector<16x1xf32> to vector<16x32xf32>
    %390 = arith.mulf %385, %389 : vector<16x32xf32>
    %391 = vector.broadcast %371 : vector<1x32xf32> to vector<16x32xf32>
    %392 = arith.mulf %390, %391 : vector<16x32xf32>
    %393 = vector.broadcast %372 : vector<1x32xf32> to vector<16x32xf32>
    %394 = arith.addf %392, %393 : vector<16x32xf32>
    %395 = vector.extract_strided_slice %238 {offsets = [0, 256], sizes = [32, 64], strides = [1, 1]} : vector<32x320xf32> to vector<32x64xf32>
    %cst_118 = arith.constant dense<0.000000e+00> : vector<16x64xf32>
    %396 = tpu.matmul %394, %395, %cst_118 {dimension_numbers = #tpu.dot_dimension_numbers<[1], [0], [0], [1], [0, 0, 1, 1], [], []>} : vector<16x32xf32>, vector<32x64xf32>, vector<16x64xf32> -> vector<16x64xf32>
    %397 = vector.extract_strided_slice %239 {offsets = [0, 256], sizes = [1, 64], strides = [1, 1]} : vector<1x320xf32> to vector<1x64xf32>
    %398 = vector.broadcast %397 : vector<1x64xf32> to vector<16x64xf32>
    %399 = arith.addf %396, %398 : vector<16x64xf32>
    %400 = arith.mulf %399, %399 : vector<16x64xf32>
    %401 = arith.mulf %399, %400 : vector<16x64xf32>
    %cst_119 = arith.constant 4.471500e-02 : f32
    %402 = vector.broadcast %cst_119 : f32 to vector<16x64xf32>
    %403 = arith.mulf %402, %401 : vector<16x64xf32>
    %404 = arith.addf %399, %403 : vector<16x64xf32>
    %cst_120 = arith.constant 0.797884583 : f32
    %405 = vector.broadcast %cst_120 : f32 to vector<16x64xf32>
    %406 = arith.mulf %405, %404 : vector<16x64xf32>
    %407 = math.tanh %406 : vector<16x64xf32>
    %cst_121 = arith.constant 1.000000e+00 : f32
    %408 = vector.broadcast %cst_121 : f32 to vector<16x64xf32>
    %409 = arith.addf %408, %407 : vector<16x64xf32>
    %cst_122 = arith.constant 5.000000e-01 : f32
    %410 = vector.broadcast %cst_122 : f32 to vector<16x64xf32>
    %411 = arith.mulf %410, %409 : vector<16x64xf32>
    %412 = arith.mulf %399, %411 : vector<16x64xf32>
    %c1_123 = arith.constant 1 : index
    %c0_124 = arith.constant 0 : index
    %c0_125 = arith.constant 0 : index
    %413 = vector.load %arg6[%c1_123, %c0_124, %c0_125] : memref<2x64x32xf32, #tpu.memory_space<vmem>>, vector<1x64x32xf32>
    %414 = vector.shape_cast %413 : vector<1x64x32xf32> to vector<64x32xf32>
    %cst_126 = arith.constant dense<0.000000e+00> : vector<16x32xf32>
    %415 = tpu.matmul %412, %414, %cst_126 {dimension_numbers = #tpu.dot_dimension_numbers<[1], [0], [0], [1], [0, 0, 1, 1], [], []>} : vector<16x64xf32>, vector<64x32xf32>, vector<16x32xf32> -> vector<16x32xf32>
    %c15 = arith.constant 15 : index
    %c0_127 = arith.constant 0 : index
    %416 = vector.load %arg7[%c15, %c0_127] : memref<16x32xf32, #tpu.memory_space<vmem>>, vector<1x32xf32>
    %417 = vector.broadcast %416 : vector<1x32xf32> to vector<16x32xf32>
    %418 = arith.addf %415, %417 : vector<16x32xf32>
    %419 = arith.addf %394, %418 : vector<16x32xf32>
    %c13 = arith.constant 13 : index
    %c0_128 = arith.constant 0 : index
    %420 = vector.load %arg7[%c13, %c0_128] : memref<16x32xf32, #tpu.memory_space<vmem>>, vector<1x32xf32>
    %c14 = arith.constant 14 : index
    %c0_129 = arith.constant 0 : index
    %421 = vector.load %arg7[%c14, %c0_129] : memref<16x32xf32, #tpu.memory_space<vmem>>, vector<1x32xf32>
    %cst_130 = arith.constant dense<0.000000e+00> : vector<16xf32>
    %422 = vector.multi_reduction <add>, %419, %cst_130 [1] : vector<16x32xf32> to vector<16xf32>
    %423 = vector.shape_cast %422 : vector<16xf32> to vector<16x1xf32>
    %cst_131 = arith.constant 3.200000e+01 : f32
    %424 = vector.broadcast %cst_131 : f32 to vector<16x1xf32>
    %425 = arith.divf %423, %424 : vector<16x1xf32>
    %426 = vector.broadcast %425 : vector<16x1xf32> to vector<16x32xf32>
    %427 = arith.subf %419, %426 : vector<16x32xf32>
    %428 = arith.mulf %427, %427 : vector<16x32xf32>
    %cst_132 = arith.constant dense<0.000000e+00> : vector<16xf32>
    %429 = vector.multi_reduction <add>, %428, %cst_132 [1] : vector<16x32xf32> to vector<16xf32>
    %430 = vector.shape_cast %429 : vector<16xf32> to vector<16x1xf32>
    %cst_133 = arith.constant 3.200000e+01 : f32
    %431 = vector.broadcast %cst_133 : f32 to vector<16x1xf32>
    %432 = arith.divf %430, %431 : vector<16x1xf32>
    %433 = vector.broadcast %425 : vector<16x1xf32> to vector<16x32xf32>
    %434 = arith.subf %419, %433 : vector<16x32xf32>
    %cst_134 = arith.constant 9.99999974E-6 : f32
    %435 = vector.broadcast %cst_134 : f32 to vector<16x1xf32>
    %436 = arith.addf %432, %435 : vector<16x1xf32>
    %437 = math.rsqrt %436 : vector<16x1xf32>
    %438 = vector.broadcast %437 : vector<16x1xf32> to vector<16x32xf32>
    %439 = arith.mulf %434, %438 : vector<16x32xf32>
    %440 = vector.broadcast %420 : vector<1x32xf32> to vector<16x32xf32>
    %441 = arith.mulf %439, %440 : vector<16x32xf32>
    %442 = vector.broadcast %421 : vector<1x32xf32> to vector<16x32xf32>
    %443 = arith.addf %441, %442 : vector<16x32xf32>
    %c0_135 = arith.constant 0 : index
    %c0_136 = arith.constant 0 : index
    %444 = vector.load %arg4[%c0_135, %c0_136] : memref<33x128xf32, #tpu.memory_space<vmem>>, vector<32x128xf32>
    %c32 = arith.constant 32 : index
    %c0_137 = arith.constant 0 : index
    %445 = vector.load %arg4[%c32, %c0_137] : memref<33x128xf32, #tpu.memory_space<vmem>>, vector<1x128xf32>
    %cst_138 = arith.constant dense<0.000000e+00> : vector<16x128xf32>
    %446 = tpu.matmul %443, %444, %cst_138 {dimension_numbers = #tpu.dot_dimension_numbers<[1], [0], [0], [1], [0, 0, 1, 1], [], []>} : vector<16x32xf32>, vector<32x128xf32>, vector<16x128xf32> -> vector<16x128xf32>
    %447 = vector.broadcast %445 : vector<1x128xf32> to vector<16x128xf32>
    %448 = arith.addf %446, %447 : vector<16x128xf32>
    %c0_139 = arith.constant 0 : index
    %c0_140 = arith.constant 0 : index
    %449 = vector.load %arg3[%c0_139, %c0_140] : memref<16x1xi32, #tpu.memory_space<vmem>>, vector<16x1xi32>
    %cst_141 = arith.constant dense<0xFF800000> : vector<16xf32>
    %450 = vector.multi_reduction <maximumf>, %448, %cst_141 [1] : vector<16x128xf32> to vector<16xf32>
    %451 = vector.shape_cast %450 : vector<16xf32> to vector<16x1xf32>
    %452 = vector.broadcast %451 : vector<16x1xf32> to vector<16x128xf32>
    %453 = arith.subf %448, %452 : vector<16x128xf32>
    %454 = math.exp %453 : vector<16x128xf32>
    %cst_142 = arith.constant dense<0.000000e+00> : vector<16xf32>
    %455 = vector.multi_reduction <add>, %454, %cst_142 [1] : vector<16x128xf32> to vector<16xf32>
    %456 = vector.shape_cast %455 : vector<16xf32> to vector<16x1xf32>
    %457 = math.log %456 : vector<16x1xf32>
    %458 = arith.addf %457, %451 : vector<16x1xf32>
    %459 = tpu.iota {dimensions = array<i32: 1>} : vector<16x128xi32>
    %460 = vector.broadcast %449 : vector<16x1xi32> to vector<16x128xi32>
    %461 = arith.cmpi eq, %459, %460 : vector<16x128xi32>
    %cst_143 = arith.constant 0.000000e+00 : f32
    %462 = vector.broadcast %cst_143 : f32 to vector<16x128xf32>
    %463 = arith.select %461, %448, %462 : vector<16x128xi1>, vector<16x128xf32>
    %cst_144 = arith.constant dense<0.000000e+00> : vector<16xf32>
    %464 = vector.multi_reduction <add>, %463, %cst_144 [1] : vector<16x128xf32> to vector<16xf32>
    %465 = vector.shape_cast %464 : vector<16xf32> to vector<16x1xf32>
    %c-100_i32 = arith.constant -100 : i32
    %466 = vector.broadcast %c-100_i32 : i32 to vector<16x1xi32>
    %467 = arith.cmpi ne, %449, %466 : vector<16x1xi32>
    %468 = arith.extui %467 : vector<16x1xi1> to vector<16x1xi32>
    %469 = arith.sitofp %468 : vector<16x1xi32> to vector<16x1xf32>
    %470 = arith.subf %458, %465 : vector<16x1xf32>
    %471 = arith.mulf %470, %469 : vector<16x1xf32>
    %472 = tpu.concatenate %471, %469 in 1 : vector<16x1xf32>, vector<16x1xf32> -> vector<16x2xf32>
    %cst_145 = arith.constant 1.000000e+00 : f32
    %473 = vector.broadcast %cst_145 : f32 to vector<1x16xf32>
    %cst_146 = arith.constant dense<0.000000e+00> : vector<1x2xf32>
    %474 = tpu.matmul %473, %472, %cst_146 {dimension_numbers = #tpu.dot_dimension_numbers<[1], [0], [0], [1], [0, 0, 1, 1], [], []>} : vector<1x16xf32>, vector<16x2xf32>, vector<1x2xf32> -> vector<1x2xf32>
    %475 = vector.extract_strided_slice %474 {offsets = [0, 0], sizes = [1, 1], strides = [1, 1]} : vector<1x2xf32> to vector<1x1xf32>
    %476 = vector.extract_strided_slice %474 {offsets = [0, 1], sizes = [1, 1], strides = [1, 1]} : vector<1x2xf32> to vector<1x1xf32>
    %cst_147 = arith.constant 1.000000e+00 : f32
    %477 = vector.broadcast %cst_147 : f32 to vector<1x1xf32>
    %478 = arith.maximumf %476, %477 : vector<1x1xf32>
    %479 = arith.divf %475, %478 : vector<1x1xf32>
    %c0_148 = arith.constant 0 : index
    %c0_149 = arith.constant 0 : index
    %480 = vector.load %arg8[%c0_148, %c0_149] : memref<1x1xf32, #tpu.memory_space<vmem>>, vector<1x1xf32>
    tpu.vector_store %arg8[%c0_148, %c0_149], %479 {strides = array<i32>} : memref<1x1xf32, #tpu.memory_space<vmem>>, vector<1x1xf32>,
    return
  }
}

</mosaic_0001>

<bundles_post_ra>
// kernel: bart_loss.1
= control target key start
LH: loop header
LB: loop body
LE: loop exit
PB: predicated region body
PF: predicated region fallthrough
CT: control target
= control target key end

     0   :  { %vm40_vm0 = vcmask 261120   ;;  %s3144_s0 = inlined_call_operand.vmem [shape: f32[32,32], index: 0, kind: input, shape index: {}]   ;;  %s3145_s1 = inlined_call_operand.vmem [shape: f32[16,16], index: 1, kind: input, shape index: {}]   ;;  %s3146_s2 = inlined_call_operand.vmem [shape: f32[16,16], index: 2, kind: input, shape index: {}]   ;;  %s3147_s3 = inlined_call_operand.vmem [shape: s32[16,1], index: 3, kind: input, shape index: {}]   ;;  %s3148_s4 = inlined_call_operand.vmem [shape: f32[33,128], index: 4, kind: input, shape index: {}]   ;;  %s3149_s5 = inlined_call_operand.vmem [shape: f32[2,33,320], index: 5, kind: input, shape index: {}]   ;;  %s3150_s6 = inlined_call_operand.vmem [shape: f32[2,64,32], index: 6, kind: input, shape index: {}]   ;;  %s3151_s7 = inlined_call_operand.vmem [shape: f32[16,32], index: 7, kind: input, shape index: {}]   ;;  %s3152_s8 = inlined_call_operand.hbm [shape: f32[1,1], index: 8, kind: output, shape index: {}]  }
   0x1   :  { %v30_v0 = vld [vmem:[%s3144_s0] sm:$0xff]  ;;  %v31_v1 = vld [vmem:[%s3144_s0 + $0x8] sm:$0xff] }
   0x2   :  { %v41_v2 = vsel %vm40_vm0, %v30_v0, 0.0  ;;  %v44_v3 = vsel %vm40_vm0, %v31_v1, 0.0 }
   0x3   :  { %42 = vadd.xlane.f32.xlu0 %v41_v2 }
   0x4   :  { %13 = vsyncpa [#allocation3], 0  ;;  %v2495_v4 = vmov 32.0   ;;  %v2570_v21 = vld [vmem:[%s3149_s5 + $0x48] sm:$0xff]  ;;  %v2576_v22 = vld [vmem:[%s3149_s5 + $0x30] sm:$0xff]  ;;  %s2496_s23 = smov 80  }
   0x5   :  { %2351 = vrcp.f32 %v2495_v4  ;;  %132 = vmatpush.msra.mxu0 %v2570_v21  ;;  %v2582_v23 = vld [vmem:[%s3149_s5 + $0x18] sm:$0xff]  ;;  %v2588_v24 = vld [vmem:[%s3149_s5] sm:$0xff]  ;;  %s2497_s24 = smov 96   ;;  %s2498_s25 = smov 64   ;;  %vm149_vm8 = vcmask 130048  }
   0x6   :  { %v2230_v25 = vpack.i.bf16 %v2582_v23, %v2570_v21  ;;  %v2235_v26 = vpack.i.bf16 %v2588_v24, %v2576_v22  ;;  %v2328_v41 = vld [vmem:[%s3151_s7] ss:$0 sm:$0xff]  ;;  %v2329_v45 = vld [vmem:[%s3151_s7 + $0x1] ss:$0 sm:$0xff]  ;;  %s2499_s26 = smov 112   ;;  %s2500_s9 = smov 48  }
   0x7   :  { %133 = vmatpush.msra.mxu0 %v2576_v22  ;;  %v2330_v55 = vld [vmem:[%s3149_s5 + $0x60] ss:$0 sm:$0xff]  ;;  %s2501_s10 = smov 32  }
   0x9   :  { %134 = vmatpush.msra.mxu0 %v2582_v23 }
   0xb   :  { %45 = vadd.xlane.f32.xlu0 %v44_v3  ;;  %v2352_v5 = vpop.eup %2351  ;;  %135 = vmatpush.msra.mxu0 %v2588_v24 }
   0xc   :  { %v48_v6 = vmul.f32 32.0, %v2352_v5  ;;  %vm52_vm1 = vweird.f32 %v2352_v5 }
   0xe   :  { %v49_v7 = vsub.f32 1.0, %v48_v6 }
  0x10   :  { %v50_v8 = vmul.f32 %v2352_v5, %v49_v7  ;;  %v34_v7 = vld [vmem:[%s3145_s1] sm:$0xff] }
  0x12   :  { %v51_v9 = vadd.f32 %v2352_v5, %v50_v8 }
  0x14   :  { %v2561_v10 = vsel %vm52_vm1, %v2352_v5, %v51_v9 }
  0x76   :  { %v43_v11 = vpop.xlane.xlu0 %42 }
  0x77   :  { %v54_v12 = vmul.f32 %v2561_v10, %v43_v11 }
  0x79   :  { %v56_v13 = vsub.f32 %v30_v0, %v54_v12 }
  0x7b   :  { %v58_v14 = vmul.f32 %v56_v13, %v56_v13 }
  0x7d   :  { %v60_v15 = vsel %vm40_vm0, %v58_v14, 0.0 }
  0x7e   :  { %61 = vadd.xlane.f32.xlu1 %v60_v15  ;;  %v46_v16 = vpop.xlane.xlu0 %45 }
  0x7f   :  { %v55_v17 = vmul.f32 %v2561_v10, %v46_v16 }
  0x81   :  { %v57_v18 = vsub.f32 %v31_v1, %v55_v17 }
  0x83   :  { %v59_v19 = vmul.f32 %v57_v18, %v57_v18 }
  0x85   :  { %v63_v20 = vsel %vm40_vm0, %v59_v19, 0.0 }
  0x86   :  { %64 = vadd.xlane.f32.xlu1 %v63_v20 }
  0xf1   :  { %v62_v27 = vpop.xlane.xlu1 %61 }
  0xf2   :  { %v66_v28 = vmul.f32 %v62_v27, %v2561_v10 }
  0xf4   :  { %v68_v29 = vadd.f32 1e-05, %v66_v28 }
  0xf6   :  { %2353 = vrsqrt.f32 %v68_v29  ;;  %vm76_vm3 = vweird.f32 %v68_v29 }
  0xf9   :  { %v65_v30 = vpop.xlane.xlu1 %64 }
  0xfa   :  { %v67_v31 = vmul.f32 %v65_v30, %v2561_v10 }
  0xfc   :  { %v2354_v32 = vpop.eup %2353  ;;  %v69_v33 = vadd.f32 1e-05, %v67_v31 }
  0xfd   :  { %v71_v34 = vmul.f32 %v2354_v32, %v68_v29  ;;  %vm77_vm2 = vweird.f32 %v2354_v32 }
  0xfe   :  { %2355 = vrsqrt.f32 %v69_v33  ;;  %vm78_vm4 = vmor %vm76_vm3, %vm77_vm2  ;;  %vm86_vm6 = vweird.f32 %v69_v33 }
  0xff   :  { %v72_v35 = vmul.f32 %v2354_v32, %v71_v34 }
 0x101   :  { %v73_v36 = vmul.f32 0.5, %v72_v35 }
 0x103   :  { %v74_v37 = vsub.f32 1.5, %v73_v36 }
 0x104   :  { %v2356_v38 = vpop.eup %2355 }
 0x105   :  { %v75_v39 = vmul.f32 %v2354_v32, %v74_v37  ;;  %v81_v40 = vmul.f32 %v2356_v38, %v69_v33  ;;  %vm87_vm5 = vweird.f32 %v2356_v38 }
 0x106   :  { %vm88_vm7 = vmor %vm86_vm6, %vm87_vm5  ;;  %vm938_vm6 = vcmask 523264  }
 0x107   :  { %v79_v42 = vsel %vm78_vm4, %v2354_v32, %v75_v39  ;;  %v82_v43 = vmul.f32 %v2356_v38, %v81_v40 }
 0x108   :  { %v90_v44 = vmul.f32 %v79_v42, %v56_v13  ;;  %v35_v13 = vld [vmem:[%s3145_s1 + $0x8] sm:$0xff] }
 0x109   :  { %v83_v46 = vmul.f32 0.5, %v82_v43 }
 0x10a   :  { %v93_v47 = vmul.f32 %v2328_v41, %v90_v44 }
 0x10b   :  { %v84_v48 = vsub.f32 1.5, %v83_v46 }
 0x10c   :  { %v2603_v49 = vadd.f32 %v2329_v45, %v93_v47 }
 0x10d   :  { %v85_v50 = vmul.f32 %v2356_v38, %v84_v48 }
 0x10e   :  { %2095 = vmatmul.msk.f32.vlgmr.msra.gmra.mxu0 %vm40_vm0, %v2603_v49 }
 0x10f   :  { %v89_v51 = vsel %vm88_vm7, %v2356_v38, %v85_v50 }
 0x110   :  { %v91_v52 = vmul.f32 %v89_v51, %v57_v18 }
 0x112   :  { %v94_v53 = vmul.f32 %v2328_v41, %v91_v52 }
 0x114   :  { %v2607_v54 = vadd.f32 %v2329_v45, %v94_v53 }
 0x116   :  { %2096 = vmatmul.msk.f32.gmra.mxu0 %vm40_vm0, %v2607_v54 }
 0x18b   :  { %v137_v56 = vpop.f32.mrf.mxu0 }
 0x18c   :  { %v138_v57 = vadd.f32 %v2330_v55, %v137_v56 }
 0x18e   :  { %246 = vrot.lane.b32.xlu1 %v138_v57, %s2496_s23 }
 0x193   :  { %v140_v58 = vpop.f32.mrf.mxu0 }
 0x194   :  { %v141_v59 = vadd.f32 %v2330_v55, %v140_v58 }
 0x196   :  { %248 = vrot.lane.b32.xlu0 %v141_v59, %s2496_s23  ;;  %147 = vrot.lane.b32.xlu2 %v141_v59, %s2497_s24  ;;  %v2220_v60 = vpack.i.bf16 %v138_v57, %v141_v59 }
 0x198   :  { %2221 = vrot.lane.b32.xlu1 %v2220_v60, %s2498_s25 }
 0x19e   :  { %145 = vrot.lane.b32.xlu2 %v138_v57, %s2497_s24 }
 0x1a6   :  { %242 = vrot.lane.b32.xlu2 %v138_v57, %s2499_s26 }
 0x1ae   :  { %244 = vrot.lane.b32.xlu2 %v141_v59, %s2499_s26 }
 0x1f0   :  { %v148_v61 = vpop.permute.xlu2 %147 }
 0x1f1   :  { %2097 = vmatpush.xpose.msk.msra.mxu1 %vm149_vm8, %v148_v61 }
 0x1f8   :  { %v146_v62 = vpop.permute.xlu2 %145 }
 0x1f9   :  { %2098 = vmatpush.xpose.msk.msra.mxu1 %vm149_vm8, %v146_v62 }
 0x1fc   :  { %2099 = vmatmul.msk.f32.vlgmr.msra.gmra.mxu1 %vm149_vm8, %v138_v57 }
 0x200   :  { %v247_v63 = vpop.permute.xlu1 %246  ;;  %v243_v3 = vpop.permute.xlu2 %242 }
 0x204   :  { %2100 = vmatmul.msk.f32.gmra.mxu1 %vm149_vm8, %v141_v59 }
 0x208   :  { %v249_v0 = vpop.permute.xlu0 %248  ;;  %v245_v5 = vpop.permute.xlu2 %244 }
 0x209   :  { %2103 = vmatpush.xpose.msk.msra.mxu3 %vm149_vm8, %v249_v0 }
 0x20a   :  { %v2222_v1 = vpop.permute.xlu1 %2221 }
 0x20b   :  { %v2223_v2 = vunpack.i.l.bf16 %v2222_v1  ;;  %v2224_v4 = vunpack.i.h.bf16 %v2222_v1 }
 0x20d   :  { %229 = vmatpush.msra.mxu2 %v2223_v2  ;;  %2104 = vmatpush.xpose.msk.msra.mxu3 %vm149_vm8, %v247_v63 }
 0x20f   :  { %230 = vmatpush.msra.mxu2 %v2224_v4 }
 0x210   :  { %2105 = vmatmul.msk.f32.vlgmr.msra.gmra.mxu3 %vm149_vm8, %v243_v3 }
 0x218   :  { %2106 = vmatmul.msk.f32.gmra.mxu3 %vm149_vm8, %v245_v5 }
 0x279   :  { %v175_v6 = vpop.f32.mrf.mxu1 }
 0x27a   :  { %v181_v8 = vmul.f32 0.25, %v175_v6 }
 0x27c   :  { %v183_v9 = vadd.f32 %v181_v8, %v34_v7  ;;  %v2664_v8 = vld [vmem:[%s3149_s5 + $0x38] sm:$0xff] }
 0x27e   :  { %v185_v11 = vsel %vm149_vm8, %v183_v9, -inf }
 0x27f   :  { %186 = vmax.xlane.f32.xlu2 %v185_v11 }
 0x281   :  { %v178_v12 = vpop.f32.mrf.mxu1 }
 0x282   :  { %v182_v14 = vmul.f32 0.25, %v178_v12 }
 0x284   :  { %v184_v15 = vadd.f32 %v182_v14, %v35_v13 }
 0x286   :  { %v188_v16 = vsel %vm149_vm8, %v184_v15, -inf }
 0x287   :  { %189 = vmax.xlane.f32.xlu0 %v188_v16 }
 0x293   :  { %v275_v17 = vpop.f32.mrf.mxu3 }
 0x294   :  { %v281_v18 = vmul.f32 0.25, %v275_v17 }
 0x296   :  { %v283_v19 = vadd.f32 %v281_v18, %v34_v7 }
 0x298   :  { %v285_v20 = vsel %vm149_vm8, %v283_v19, -inf }
 0x299   :  { %286 = vmax.xlane.f32.xlu1 %v285_v20 }
 0x29b   :  { %2226 = vrot.lane.b32.xlu0 %v2220_v60, %s2500_s9  ;;  %v278_v27 = vpop.f32.mrf.mxu3 }
 0x29c   :  { %v282_v28 = vmul.f32 0.25, %v278_v27 }
 0x29e   :  { %v284_v29 = vadd.f32 %v282_v28, %v35_v13 }
 0x2a0   :  { %v288_v30 = vsel %vm149_vm8, %v284_v29, -inf }
 0x2a1   :  { %289 = vmax.xlane.f32.xlu2 %v288_v30 }
 0x2b2   :  { %2231 = vrot.lane.b32.xlu1 %v2230_v25, %s2501_s10 }
 0x2ba   :  { %417 = vrot.lane.b32.xlu1 %v2330_v55, %s2501_s10 }
 0x2f2   :  { %v187_v31 = vpop.xlane.xlu2 %186 }
 0x2f3   :  { %v191_v32 = vsub.f32 %v183_v9, %v187_v31  ;;  %v2669_v9 = vld [vmem:[%s3149_s5 + $0x50] sm:$0xff]  ;;  %v2683_v31 = vld [vmem:[%s3149_s5 + $0x20] sm:$0xff] }
 0x2f4   :  { %v2240_v11 = vpack.i.bf16 %v2664_v8, %v2669_v9  ;;  %495 = vmatpush.msrb.mxu3 %v2669_v9 }
 0x2f5   :  { %v193_v33 = vmul.f32 1.442695, %v191_v32 }
 0x2f6   :  { %496 = vmatpush.msrb.mxu3 %v2664_v8 }
 0x2f7   :  { %2357 = vpow2.f32 %v193_v33 }
 0x2f8   :  { %497 = vmatpush.msrb.mxu3 %v2683_v31 }
 0x2fa   :  { %v190_v34 = vpop.xlane.xlu0 %189 }
 0x2fb   :  { %v192_v35 = vsub.f32 %v184_v15, %v190_v34 }
 0x2fd   :  { %v2358_v36 = vpop.eup %2357  ;;  %v195_v37 = vmul.f32 1.442695, %v192_v35 }
 0x2fe   :  { %2101 = vmatmul.msk.f32.vlgmr.msra.gmra.mxu2 %vm149_vm8, %v2358_v36  ;;  %v197_v38 = vsel %vm149_vm8, %v2358_v36, 0.0 }
 0x2ff   :  { %2359 = vpow2.f32 %v195_v37  ;;  %198 = vadd.xlane.f32.xlu2 %v197_v38 }
 0x305   :  { %v2360_v39 = vpop.eup %2359 }
 0x306   :  { %2102 = vmatmul.msk.f32.gmra.mxu2 %vm149_vm8, %v2360_v39  ;;  %v200_v51 = vsel %vm149_vm8, %v2360_v39, 0.0 }
 0x30c   :  { %v287_v21 = vpop.xlane.xlu1 %286 }
 0x30d   :  { %v291_v23 = vsub.f32 %v283_v19, %v287_v21  ;;  %v2227_v25 = vpop.permute.xlu0 %2226 }
 0x30e   :  { %v2228_v40 = vunpack.i.l.bf16 %v2227_v25  ;;  %v2229_v42 = vunpack.i.h.bf16 %v2227_v25 }
 0x30f   :  { %v293_v41 = vmul.f32 1.442695, %v291_v23 }
 0x310   :  { %329 = vmatpush.msrb.mxu2 %v2228_v40 }
 0x311   :  { %2361 = vpow2.f32 %v293_v41 }
 0x312   :  { %330 = vmatpush.msrb.mxu2 %v2229_v42 }
 0x314   :  { %v290_v43 = vpop.xlane.xlu2 %289 }
 0x315   :  { %v292_v44 = vsub.f32 %v284_v29, %v290_v43 }
 0x317   :  { %v2362_v45 = vpop.eup %2361  ;;  %v295_v46 = vmul.f32 1.442695, %v292_v44 }
 0x318   :  { %2107 = vmatmul.msk.f32.vlgmr.msrb.gmra.mxu2 %vm149_vm8, %v2362_v45  ;;  %v297_v47 = vsel %vm149_vm8, %v2362_v45, 0.0  ;;  %v2703_v45 = vld [vmem:[%s3149_s5 + $0x68] ss:$0 sm:$0xff] }
 0x319   :  { %2363 = vpow2.f32 %v295_v46  ;;  %298 = vadd.xlane.f32.xlu2 %v297_v47 }
 0x31f   :  { %v2364_v48 = vpop.eup %2363 }
 0x320   :  { %2108 = vmatmul.msk.f32.gmra.mxu2 %vm149_vm8, %v2364_v48  ;;  %v300_v50 = vsel %vm149_vm8, %v2364_v48, 0.0 }
 0x321   :  { %301 = vadd.xlane.f32.xlu0 %v300_v50  ;;  %201 = vadd.xlane.f32.xlu2 %v200_v51 }
 0x324   :  { %v2232_v52 = vpop.permute.xlu1 %2231 }
 0x325   :  { %v2233_v53 = vunpack.i.l.bf16 %v2232_v52  ;;  %v2234_v55 = vunpack.i.h.bf16 %v2232_v52 }
 0x327   :  { %370 = vmatpush.msrb.mxu0 %v2233_v53  ;;  %407 = vmatpush.msrb.mxu1 %v2234_v55 }
 0x32c   :  { %v418_v12 = vpop.permute.xlu1 %417 }
 0x335   :  { %2241 = vrot.lane.b32.xlu0 %v2240_v11, %s2497_s24 }
 0x339   :  { %2236 = vrot.lane.b32.xlu2 %v2235_v26, %s2501_s10 }
 0x372   :  { %v199_v56 = vpop.xlane.xlu2 %198 }
 0x373   :  { %2365 = vrcp.f32 %v199_v56 }
 0x379   :  { %v2366_v62 = vpop.eup %2365 }
 0x381   :  { %v232_v57 = vpop.f32.mrf.mxu2 }
 0x382   :  { %v240_v26 = vmul.f32 %v2366_v62, %v232_v57 }
 0x389   :  { %v235_v59 = vpop.f32.mrf.mxu2 }
 0x38c   :  { %v299_v58 = vpop.xlane.xlu2 %298 }
 0x38d   :  { %2367 = vrcp.f32 %v299_v58 }
 0x393   :  { %v2368_v1 = vpop.eup %2367 }
 0x394   :  { %v202_v60 = vpop.xlane.xlu2 %201  ;;  %v302_v63 = vpop.xlane.xlu0 %301 }
 0x395   :  { %2369 = vrcp.f32 %v202_v60 }
 0x396   :  { %2371 = vrcp.f32 %v302_v63 }
 0x39b   :  { %v332_v61 = vpop.f32.mrf.mxu2  ;;  %v2370_v3 = vpop.eup %2369 }
 0x39c   :  { %v2237_v0 = vpop.permute.xlu2 %2236  ;;  %v340_v2 = vmul.f32 %v2368_v1, %v332_v61  ;;  %v2372_v5 = vpop.eup %2371  ;;  %v241_v7 = vmul.f32 %v2370_v3, %v235_v59  ;;  %v2331_v61 = vld [vmem:[%s3151_s7 + $0x2] ss:$0 sm:$0xff] }
 0x39d   :  { %v2238_v22 = vunpack.i.l.bf16 %v2237_v0  ;;  %v2239_v24 = vunpack.i.h.bf16 %v2237_v0 }
 0x39f   :  { %371 = vmatpush.msrb.mxu0 %v2238_v22  ;;  %408 = vmatpush.msrb.mxu1 %v2239_v24  ;;  %v32_v22 = vld [vmem:[%s3144_s0 + $0x10] sm:$0xff]  ;;  %v2332_v24 = vld [vmem:[%s3151_s7 + $0x3] ss:$0 sm:$0xff] }
 0x3a0   :  { %2109 = vmatmul.msk.f32.vlgmr.msrb.gmra.mxu0 %vm149_vm8, %v340_v2  ;;  %2111 = vmatmul.msk.f32.vlgmr.msrb.gmra.mxu1 %vm149_vm8, %v240_v26 }
 0x3a3   :  { %v335_v4 = vpop.f32.mrf.mxu2 }
 0x3a4   :  { %v341_v6 = vmul.f32 %v2372_v5, %v335_v4 }
 0x3a7   :  { %v2242_v32 = vpop.permute.xlu0 %2241 }
 0x3a8   :  { %2110 = vmatmul.msk.f32.gmra.mxu0 %vm149_vm8, %v341_v6  ;;  %2112 = vmatmul.msk.f32.gmra.mxu1 %vm149_vm8, %v241_v7  ;;  %v2244_v33 = vunpack.i.h.bf16 %v2242_v32  ;;  %v33_v7 = vld [vmem:[%s3144_s0 + $0x18] sm:$0xff] }
 0x41d   :  { %v373_v13 = vpop.f32.mrf.mxu0  ;;  %v410_v14 = vpop.f32.mrf.mxu1 }
 0x41e   :  { %v411_v15 = vadd.f32 %v410_v14, %v373_v13 }
 0x420   :  { %v420_v16 = vadd.f32 %v418_v12, %v411_v15 }
 0x422   :  { %v422_v17 = vadd.f32 %v420_v16, %v2603_v49  ;;  %v2689_v49 = vld [vmem:[%s3149_s5 + $0x8] sm:$0xff] }
 0x423   :  { %498 = vmatpush.msrb.mxu3 %v2689_v49  ;;  %v2245_v41 = vpack.i.bf16 %v2689_v49, %v2683_v31 }
 0x424   :  { %v426_v18 = vsel %vm40_vm0, %v422_v17, 0.0 }
 0x425   :  { %427 = vadd.xlane.f32.xlu1 %v426_v18  ;;  %v376_v19 = vpop.f32.mrf.mxu0  ;;  %v413_v20 = vpop.f32.mrf.mxu1 }
 0x426   :  { %v414_v27 = vadd.f32 %v413_v20, %v376_v19 }
 0x428   :  { %v421_v28 = vadd.f32 %v418_v12, %v414_v27 }
 0x42a   :  { %v423_v29 = vadd.f32 %v421_v28, %v2607_v54  ;;  %v2243_v54 = vunpack.i.l.bf16 %v2242_v32 }
 0x42c   :  { %v429_v30 = vsel %vm40_vm0, %v423_v29, 0.0  ;;  %544 = vmatpush.msra.mxu2 %v2243_v54 }
 0x42d   :  { %430 = vadd.xlane.f32.xlu2 %v429_v30 }
 0x42e   :  { %545 = vmatpush.msra.mxu2 %v2244_v33 }
 0x445   :  { %523 = vrot.lane.b32.xlu2 %v2703_v45, %s2497_s24 }
 0x498   :  { %v428_v34 = vpop.xlane.xlu1 %427 }
 0x499   :  { %v432_v35 = vmul.f32 %v428_v34, %v2561_v10 }
 0x49b   :  { %v434_v36 = vsub.f32 %v422_v17, %v432_v35  ;;  %v36_v35 = vld [vmem:[%s3146_s2] sm:$0xff] }
 0x49d   :  { %v436_v37 = vmul.f32 %v434_v36, %v434_v36 }
 0x49f   :  { %v438_v38 = vsel %vm40_vm0, %v436_v37, 0.0 }
 0x4a0   :  { %439 = vadd.xlane.f32.xlu0 %v438_v38  ;;  %v431_v39 = vpop.xlane.xlu2 %430 }
 0x4a1   :  { %v433_v21 = vmul.f32 %v431_v39, %v2561_v10 }
 0x4a3   :  { %v435_v23 = vsub.f32 %v423_v29, %v433_v21  ;;  %v37_v21 = vld [vmem:[%s3146_s2 + $0x8] sm:$0xff] }
 0x4a5   :  { %v437_v25 = vmul.f32 %v435_v23, %v435_v23 }
 0x4a7   :  { %v441_v40 = vsel %vm40_vm0, %v437_v25, 0.0 }
 0x4a8   :  { %442 = vadd.xlane.f32.xlu1 %v441_v40  ;;  %v524_v14 = vpop.permute.xlu2 %523 }
 0x4b4   :  { %2246 = vrot.lane.b32.xlu0 %v2245_v41, %s2497_s24 }
 0x513   :  { %v440_v42 = vpop.xlane.xlu0 %439 }
 0x514   :  { %v444_v43 = vmul.f32 %v440_v42, %v2561_v10 }
 0x516   :  { %v446_v44 = vadd.f32 1e-05, %v444_v43 }
 0x518   :  { %2373 = vrsqrt.f32 %v446_v44  ;;  %vm454_vm10 = vweird.f32 %v446_v44 }
 0x51b   :  { %v443_v46 = vpop.xlane.xlu1 %442 }
 0x51c   :  { %v445_v47 = vmul.f32 %v443_v46, %v2561_v10 }
 0x51e   :  { %v2374_v48 = vpop.eup %2373  ;;  %v447_v50 = vadd.f32 1e-05, %v445_v47 }
 0x51f   :  { %v449_v51 = vmul.f32 %v2374_v48, %v446_v44  ;;  %vm455_vm9 = vweird.f32 %v2374_v48 }
 0x520   :  { %2375 = vrsqrt.f32 %v447_v50  ;;  %vm456_vm11 = vmor %vm454_vm10, %vm455_vm9  ;;  %vm464_vm13 = vweird.f32 %v447_v50 }
 0x521   :  { %v450_v52 = vmul.f32 %v2374_v48, %v449_v51 }
 0x523   :  { %v451_v53 = vmul.f32 0.5, %v450_v52 }
 0x525   :  { %v452_v55 = vsub.f32 1.5, %v451_v53 }
 0x526   :  { %v2376_v56 = vpop.eup %2375  ;;  %v2247_v57 = vpop.permute.xlu0 %2246 }
 0x527   :  { %v453_v58 = vmul.f32 %v2374_v48, %v452_v55  ;;  %v459_v59 = vmul.f32 %v2376_v56, %v447_v50  ;;  %v2248_v60 = vunpack.i.l.bf16 %v2247_v57  ;;  %v2249_v1 = vunpack.i.h.bf16 %v2247_v57 }
 0x528   :  { %vm465_vm12 = vweird.f32 %v2376_v56 }
 0x529   :  { %v457_v62 = vsel %vm456_vm11, %v2374_v48, %v453_v58  ;;  %v460_v63 = vmul.f32 %v2376_v56, %v459_v59  ;;  %546 = vmatpush.msra.mxu2 %v2248_v60  ;;  %vm466_vm14 = vmor %vm464_vm13, %vm465_vm12 }
 0x52a   :  { %v468_v0 = vmul.f32 %v457_v62, %v434_v36 }
 0x52b   :  { %v461_v26 = vmul.f32 0.5, %v460_v63  ;;  %547 = vmatpush.msra.mxu2 %v2249_v1 }
 0x52c   :  { %v471_v2 = vmul.f32 %v2331_v61, %v468_v0  ;;  %2115 = vmatmul.msk.f32.vlgmr.msra.gmra.mxu2 %vm40_vm0, %v32_v22 }
 0x52d   :  { %v462_v3 = vsub.f32 1.5, %v461_v26 }
 0x52e   :  { %v2718_v4 = vadd.f32 %v2332_v24, %v471_v2  ;;  %v2260_v2 = vpack.i.bf16 %v2683_v31, %v2669_v9 }
 0x52f   :  { %v463_v5 = vmul.f32 %v2376_v56, %v462_v3 }
 0x530   :  { %2113 = vmatmul.msk.f32.vlgmr.msrb.gmra.mxu3 %vm40_vm0, %v2718_v4 }
 0x531   :  { %v467_v6 = vsel %vm466_vm14, %v2376_v56, %v463_v5 }
 0x532   :  { %v469_v11 = vmul.f32 %v467_v6, %v435_v23 }
 0x534   :  { %v472_v12 = vmul.f32 %v2331_v61, %v469_v11  ;;  %2116 = vmatmul.msk.f32.gmra.mxu2 %vm40_vm0, %v33_v7  ;;  %v2265_v11 = vpack.i.bf16 %v2689_v49, %v2664_v8 }
 0x536   :  { %v2726_v13 = vadd.f32 %v2332_v24, %v472_v12 }
 0x538   :  { %2114 = vmatmul.msk.f32.gmra.mxu3 %vm40_vm0, %v2726_v13 }
 0x5af   :  { %v549_v15 = vpop.f32.mrf.mxu2 }
 0x5b0   :  { %v550_v16 = vadd.f32 %v549_v15, %v524_v14 }
 0x5b2   :  { %655 = vrot.lane.b32.xlu0 %v550_v16, %s2499_s26 }
 0x5b3   :  { %v500_v17 = vpop.f32.mrf.mxu3 }
 0x5b4   :  { %v501_v20 = vadd.f32 %v2703_v45, %v500_v17 }
 0x5b7   :  { %v552_v18 = vpop.f32.mrf.mxu2 }
 0x5b8   :  { %v553_v19 = vadd.f32 %v552_v18, %v524_v14 }
 0x5ba   :  { %657 = vrot.lane.b32.xlu1 %v553_v19, %s2499_s26  ;;  %2117 = vmatpush.xpose.msk.msra.mxu0 %vm149_vm8, %v553_v19  ;;  %v2250_v27 = vpack.i.bf16 %v550_v16, %v553_v19 }
 0x5bb   :  { %651 = vrot.lane.b32.xlu0 %v501_v20, %s2499_s26  ;;  %v503_v28 = vpop.f32.mrf.mxu3 }
 0x5bc   :  { %v504_v29 = vadd.f32 %v2703_v45, %v503_v28 }
 0x5be   :  { %2118 = vmatpush.xpose.msk.msra.mxu0 %vm149_vm8, %v550_v16 }
 0x5c1   :  { %2119 = vmatmul.msk.f32.vlgmr.msra.gmra.mxu0 %vm149_vm8, %v501_v20 }
 0x5c3   :  { %653 = vrot.lane.b32.xlu0 %v504_v29, %s2499_s26 }
 0x5c9   :  { %2120 = vmatmul.msk.f32.gmra.mxu0 %vm149_vm8, %v504_v29 }
 0x624   :  { %v656_v30 = vpop.permute.xlu0 %655 }
 0x62c   :  { %v658_v32 = vpop.permute.xlu1 %657 }
 0x62d   :  { %2123 = vmatpush.xpose.msk.msra.mxu3 %vm149_vm8, %v658_v32  ;;  %v652_v33 = vpop.permute.xlu0 %651 }
 0x631   :  { %2124 = vmatpush.xpose.msk.msra.mxu3 %vm149_vm8, %v656_v30 }
 0x634   :  { %2125 = vmatmul.msk.f32.vlgmr.msra.gmra.mxu3 %vm149_vm8, %v652_v33 }
 0x635   :  { %v654_v54 = vpop.permute.xlu0 %653 }
 0x63c   :  { %2126 = vmatmul.msk.f32.gmra.mxu3 %vm149_vm8, %v654_v54 }
 0x63e   :  { %v584_v34 = vpop.f32.mrf.mxu0 }
 0x63f   :  { %v590_v36 = vmul.f32 0.25, %v584_v34 }
 0x641   :  { %v592_v37 = vadd.f32 %v590_v36, %v36_v35 }
 0x643   :  { %v594_v38 = vsel %vm149_vm8, %v592_v37, -inf }
 0x644   :  { %595 = vmax.xlane.f32.xlu1 %v594_v38 }
 0x646   :  { %v587_v39 = vpop.f32.mrf.mxu0 }
 0x647   :  { %v591_v23 = vmul.f32 0.25, %v587_v39 }
 0x649   :  { %v593_v25 = vadd.f32 %v591_v23, %v37_v21 }
 0x64b   :  { %v597_v40 = vsel %vm149_vm8, %v593_v25, -inf }
 0x64c   :  { %598 = vmax.xlane.f32.xlu1 %v597_v40 }
 0x6b7   :  { %v684_v41 = vpop.f32.mrf.mxu3  ;;  %v596_v42 = vpop.xlane.xlu1 %595 }
 0x6b8   :  { %v690_v43 = vmul.f32 0.25, %v684_v41  ;;  %v600_v44 = vsub.f32 %v592_v37, %v596_v42 }
 0x6ba   :  { %v602_v46 = vmul.f32 1.442695, %v600_v44  ;;  %v692_v47 = vadd.f32 %v690_v43, %v36_v35 }
 0x6bc   :  { %2377 = vpow2.f32 %v602_v46  ;;  %v694_v48 = vsel %vm149_vm8, %v692_v47, -inf }
 0x6bd   :  { %695 = vmax.xlane.f32.xlu2 %v694_v48 }
 0x6bf   :  { %v687_v50 = vpop.f32.mrf.mxu3  ;;  %v599_v57 = vpop.xlane.xlu1 %598 }
 0x6c0   :  { %v691_v51 = vmul.f32 0.25, %v687_v50  ;;  %v601_v58 = vsub.f32 %v593_v25, %v599_v57 }
 0x6c2   :  { %v2378_v52 = vpop.eup %2377  ;;  %v693_v53 = vadd.f32 %v691_v51, %v37_v21  ;;  %v604_v59 = vmul.f32 1.442695, %v601_v58 }
 0x6c3   :  { %v606_v55 = vsel %vm149_vm8, %v2378_v52, 0.0 }
 0x6c4   :  { %607 = vadd.xlane.f32.xlu1 %v606_v55  ;;  %v697_v56 = vsel %vm149_vm8, %v693_v53, -inf  ;;  %2379 = vpow2.f32 %v604_v59 }
 0x6c5   :  { %698 = vmax.xlane.f32.xlu0 %v697_v56 }
 0x6ca   :  { %v2380_v60 = vpop.eup %2379 }
 0x6cb   :  { %v609_v61 = vsel %vm149_vm8, %v2380_v60, 0.0 }
 0x6d5   :  { %2251 = vrot.lane.b32.xlu2 %v2250_v27, %s2496_s23 }
 0x6d9   :  { %2256 = vrot.lane.b32.xlu0 %v2250_v27, %s2497_s24 }
 0x6dd   :  { %2261 = vrot.lane.b32.xlu2 %v2260_v2, %s2501_s10 }
 0x6e5   :  { %2266 = vrot.lane.b32.xlu2 %v2265_v11, %s2501_s10 }
 0x703   :  { %610 = vadd.xlane.f32.xlu0 %v609_v61 }
 0x730   :  { %v696_v62 = vpop.xlane.xlu2 %695 }
 0x731   :  { %v700_v63 = vsub.f32 %v692_v47, %v696_v62 }
 0x733   :  { %v702_v0 = vmul.f32 1.442695, %v700_v63  ;;  %v106_v63 = vld [vmem:[%s3149_s5 + $0x40] sm:$0xff] }
 0x735   :  { %2381 = vpow2.f32 %v702_v0  ;;  %v103_v0 = vld [vmem:[%s3149_s5 + $0x28] sm:$0xff] }
 0x737   :  { %v608_v20 = vpop.xlane.xlu1 %607 }
 0x738   :  { %v2252_v1 = vpop.permute.xlu2 %2251  ;;  %v699_v22 = vpop.xlane.xlu0 %698 }
 0x739   :  { %v2253_v24 = vunpack.i.l.bf16 %v2252_v1  ;;  %v701_v26 = vsub.f32 %v693_v53, %v699_v22  ;;  %v2254_v5 = vunpack.i.h.bf16 %v2252_v1  ;;  %v100_v1 = vld [vmem:[%s3149_s5 + $0x10] sm:$0xff] }
 0x73b   :  { %v2382_v3 = vpop.eup %2381  ;;  %v704_v6 = vmul.f32 1.442695, %v701_v26  ;;  %738 = vmatpush.msrb.mxu2 %v2253_v24 }
 0x73c   :  { %v706_v7 = vsel %vm149_vm8, %v2382_v3, 0.0 }
 0x73d   :  { %2383 = vpow2.f32 %v704_v6  ;;  %739 = vmatpush.msrb.mxu2 %v2254_v5  ;;  %707 = vadd.xlane.f32.xlu1 %v706_v7 }
 0x73e   :  { %2127 = vmatmul.msk.f32.vlgmr.msrb.gmra.mxu2 %vm149_vm8, %v2382_v3 }
 0x740   :  { %v2262_v8 = vpop.permute.xlu2 %2261 }
 0x741   :  { %v2264_v49 = vunpack.i.h.bf16 %v2262_v8  ;;  %v2263_v16 = vunpack.i.l.bf16 %v2262_v8  ;;  %v2334_v8 = vld [vmem:[%s3151_s7 + $0x4] ss:$0 sm:$0xff] }
 0x743   :  { %v2384_v12 = vpop.eup %2383  ;;  %777 = vmatpush.msrb.mxu0 %v2263_v16 }
 0x744   :  { %v709_v9 = vsel %vm149_vm8, %v2384_v12, 0.0 }
 0x745   :  { %710 = vadd.xlane.f32.xlu1 %v709_v9 }
 0x746   :  { %2128 = vmatmul.msk.f32.gmra.mxu2 %vm149_vm8, %v2384_v12 }
 0x748   :  { %v2267_v17 = vpop.permute.xlu2 %2266 }
 0x749   :  { %v2269_v18 = vunpack.i.h.bf16 %v2267_v17  ;;  %v2268_v19 = vunpack.i.l.bf16 %v2267_v17 }
 0x74b   :  { %v2257_v31 = vpop.permute.xlu0 %2256  ;;  %778 = vmatpush.msrb.mxu0 %v2268_v19 }
 0x74c   :  { %v2258_v14 = vunpack.i.l.bf16 %v2257_v31  ;;  %v2259_v15 = vunpack.i.h.bf16 %v2257_v31 }
 0x74e   :  { %638 = vmatpush.msra.mxu1 %v2258_v14 }
 0x750   :  { %639 = vmatpush.msra.mxu1 %v2259_v15 }
 0x751   :  { %2121 = vmatmul.msk.f32.vlgmr.msra.gmra.mxu1 %vm149_vm8, %v2378_v52 }
 0x752   :  { %812 = vmatpush.msrb.mxu1 %v2264_v49 }
 0x754   :  { %813 = vmatpush.msrb.mxu1 %v2269_v18  ;;  %v2335_v18 = vld [vmem:[%s3151_s7 + $0x5] ss:$0 sm:$0xff] }
 0x759   :  { %2122 = vmatmul.msk.f32.gmra.mxu1 %vm149_vm8, %v2380_v60 }
 0x75e   :  { %821 = vrot.lane.b32.xlu1 %v2703_v45, %s2501_s10 }
 0x776   :  { %v611_v34 = vpop.xlane.xlu0 %610 }
 0x7b0   :  { %v708_v27 = vpop.xlane.xlu1 %707 }
 0x7b1   :  { %2385 = vrcp.f32 %v708_v27 }
 0x7b7   :  { %v2386_v29 = vpop.eup %2385 }
 0x7b8   :  { %v711_v28 = vpop.xlane.xlu1 %710 }
 0x7b9   :  { %2387 = vrcp.f32 %v711_v28 }
 0x7ba   :  { %2389 = vrcp.f32 %v608_v20 }
 0x7bb   :  { %2391 = vrcp.f32 %v611_v34  ;;  %v934_v34 = vld [vmem:[%s3150_s6 + $0x30] sm:$0xff] }
 0x7bf   :  { %v2388_v45 = vpop.eup %2387 }
 0x7c0   :  { %v2390_v35 = vpop.eup %2389 }
 0x7c1   :  { %v741_v30 = vpop.f32.mrf.mxu2  ;;  %v2392_v38 = vpop.eup %2391 }
 0x7c2   :  { %v749_v32 = vmul.f32 %v2386_v29, %v741_v30 }
 0x7c4   :  { %2129 = vmatmul.msk.f32.vlgmr.msrb.gmra.mxu0 %vm149_vm8, %v749_v32 }
 0x7c9   :  { %v744_v33 = vpop.f32.mrf.mxu2 }
 0x7ca   :  { %v750_v54 = vmul.f32 %v2388_v45, %v744_v33 }
 0x7cc   :  { %2130 = vmatmul.msk.f32.gmra.mxu0 %vm149_vm8, %v750_v54  ;;  %v935_v54 = vld [vmem:[%s3150_s6 + $0x38] sm:$0xff] }
 0x7cd   :  { %953 = vmatpush.msra.mxu2 %v935_v54 }
 0x7ce   :  { %v641_v36 = vpop.f32.mrf.mxu1 }
 0x7cf   :  { %v649_v37 = vmul.f32 %v2390_v35, %v641_v36  ;;  %954 = vmatpush.msra.mxu2 %v934_v34  ;;  %v933_v35 = vld [vmem:[%s3150_s6 + $0x28] sm:$0xff]  ;;  %v932_v36 = vld [vmem:[%s3150_s6 + $0x20] sm:$0xff] }
 0x7d0   :  { %v822_v40 = vpop.permute.xlu1 %821 }
 0x7d1   :  { %2131 = vmatmul.msk.f32.vlgmr.msrb.gmra.mxu1 %vm149_vm8, %v649_v37  ;;  %955 = vmatpush.msra.mxu2 %v933_v35  ;;  %v931_v37 = vld [vmem:[%s3150_s6 + $0x18] sm:$0xff] }
 0x7d3   :  { %956 = vmatpush.msra.mxu2 %v932_v36 }
 0x7d5   :  { %957 = vmatpush.msra.mxu2 %v931_v37 }
 0x7d6   :  { %v644_v39 = vpop.f32.mrf.mxu1 }
 0x7d7   :  { %v650_v21 = vmul.f32 %v2392_v38, %v644_v39  ;;  %v930_v38 = vld [vmem:[%s3150_s6 + $0x10] sm:$0xff]  ;;  %v929_v39 = vld [vmem:[%s3150_s6 + $0x8] sm:$0xff] }
 0x7d8   :  { %958 = vmatpush.msra.mxu2 %v930_v38 }
 0x7d9   :  { %2132 = vmatmul.msk.f32.gmra.mxu1 %vm149_vm8, %v650_v21  ;;  %v928_v21 = vld [vmem:[%s3150_s6] sm:$0xff] }
 0x7da   :  { %959 = vmatpush.msra.mxu2 %v929_v39 }
 0x7dc   :  { %960 = vmatpush.msra.mxu2 %v928_v21  ;;  %v2338_v21 = vld [vmem:[%s3151_s7 + $0x6] ss:$0 sm:$0xff] }
 0x841   :  { %v780_v23 = vpop.f32.mrf.mxu0 }
 0x849   :  { %v783_v46 = vpop.f32.mrf.mxu0 }
 0x84e   :  { %v815_v25 = vpop.f32.mrf.mxu1 }
 0x84f   :  { %v816_v41 = vadd.f32 %v815_v25, %v780_v23  ;;  %v2336_v23 = vld [vmem:[%s3149_s5 + $0x70] ss:$0 sm:$0xff] }
 0x851   :  { %v824_v42 = vadd.f32 %v822_v40, %v816_v41 }
 0x853   :  { %v826_v43 = vadd.f32 %v824_v42, %v2718_v4 }
 0x855   :  { %v830_v44 = vsel %vm40_vm0, %v826_v43, 0.0 }
 0x856   :  { %v818_v47 = vpop.f32.mrf.mxu1  ;;  %831 = vadd.xlane.f32.xlu2 %v830_v44 }
 0x857   :  { %v819_v48 = vadd.f32 %v818_v47, %v783_v46 }
 0x859   :  { %v825_v50 = vadd.f32 %v822_v40, %v819_v48 }
 0x85b   :  { %v827_v51 = vadd.f32 %v825_v50, %v2726_v13  ;;  %v109_v13 = vld [vmem:[%s3149_s5 + $0x58] sm:$0xff] }
 0x85c   :  { %899 = vmatpush.msrb.mxu3 %v109_v13  ;;  %v2337_v13 = vld [vmem:[%s3151_s7 + $0x8] ss:$0 sm:$0xff] }
 0x85d   :  { %v833_v52 = vsel %vm40_vm0, %v827_v51, 0.0 }
 0x85e   :  { %834 = vadd.xlane.f32.xlu1 %v833_v52  ;;  %900 = vmatpush.msrb.mxu3 %v106_v63 }
 0x860   :  { %901 = vmatpush.msrb.mxu3 %v103_v0 }
 0x862   :  { %902 = vmatpush.msrb.mxu3 %v100_v1 }
 0x8c9   :  { %v832_v53 = vpop.xlane.xlu2 %831 }
 0x8ca   :  { %v836_v55 = vmul.f32 %v832_v53, %v2561_v10 }
 0x8cc   :  { %v838_v56 = vsub.f32 %v826_v43, %v836_v55 }
 0x8ce   :  { %v840_v57 = vmul.f32 %v838_v56, %v838_v56 }
 0x8d0   :  { %v842_v58 = vsel %vm40_vm0, %v840_v57, 0.0 }
 0x8d1   :  { %v835_v4 = vpop.xlane.xlu1 %834  ;;  %843 = vadd.xlane.f32.xlu0 %v842_v58 }
 0x8d2   :  { %v837_v59 = vmul.f32 %v835_v4, %v2561_v10 }
 0x8d4   :  { %v839_v60 = vsub.f32 %v827_v51, %v837_v59 }
 0x8d6   :  { %v841_v61 = vmul.f32 %v839_v60, %v839_v60 }
 0x8d8   :  { %v845_v62 = vsel %vm40_vm0, %v841_v61, 0.0 }
 0x8d9   :  { %846 = vadd.xlane.f32.xlu0 %v845_v62 }
 0x944   :  { %v844_v22 = vpop.xlane.xlu0 %843 }
 0x945   :  { %v848_v24 = vmul.f32 %v844_v22, %v2561_v10 }
 0x947   :  { %v850_v26 = vadd.f32 1e-05, %v848_v24 }
 0x949   :  { %2393 = vrsqrt.f32 %v850_v26  ;;  %vm858_vm1 = vweird.f32 %v850_v26 }
 0x94c   :  { %v847_v2 = vpop.xlane.xlu0 %846 }
 0x94d   :  { %v849_v3 = vmul.f32 %v847_v2, %v2561_v10 }
 0x94f   :  { %v2394_v5 = vpop.eup %2393  ;;  %v851_v6 = vadd.f32 1e-05, %v849_v3 }
 0x950   :  { %v853_v7 = vmul.f32 %v2394_v5, %v850_v26  ;;  %vm859_vm15 = vweird.f32 %v2394_v5 }
 0x951   :  { %2395 = vrsqrt.f32 %v851_v6  ;;  %vm860_vm2 = vmor %vm858_vm1, %vm859_vm15  ;;  %vm868_vm4 = vweird.f32 %v851_v6 }
 0x952   :  { %v854_v11 = vmul.f32 %v2394_v5, %v853_v7 }
 0x954   :  { %v855_v12 = vmul.f32 0.5, %v854_v11 }
 0x956   :  { %v856_v9 = vsub.f32 1.5, %v855_v12 }
 0x957   :  { %v2396_v31 = vpop.eup %2395 }
 0x958   :  { %v857_v14 = vmul.f32 %v2394_v5, %v856_v9  ;;  %v863_v15 = vmul.f32 %v2396_v31, %v851_v6  ;;  %vm869_vm3 = vweird.f32 %v2396_v31 }
 0x959   :  { %vm870_vm5 = vmor %vm868_vm4, %vm869_vm3 }
 0x95a   :  { %v861_v49 = vsel %vm860_vm2, %v2394_v5, %v857_v14  ;;  %v864_v16 = vmul.f32 %v2396_v31, %v863_v15 }
 0x95b   :  { %v872_v17 = vmul.f32 %v861_v49, %v838_v56  ;;  %v2847_v49 = vld [vmem:[%s3149_s5 + $0xc0] sm:$0xff] }
 0x95c   :  { %v865_v19 = vmul.f32 0.5, %v864_v16  ;;  %1057 = vmatpush.msra.mxu0 %v2847_v49  ;;  %v2853_v16 = vld [vmem:[%s3149_s5 + $0xa8] sm:$0xff] }
 0x95d   :  { %v875_v20 = vmul.f32 %v2334_v8, %v872_v17  ;;  %v2859_v17 = vld [vmem:[%s3149_s5 + $0x90] sm:$0xff] }
 0x95e   :  { %v866_v27 = vsub.f32 1.5, %v865_v19  ;;  %1058 = vmatpush.msra.mxu0 %v2853_v16  ;;  %v2285_v19 = vpack.i.bf16 %v2853_v16, %v2847_v49 }
 0x95f   :  { %v878_v28 = vadd.f32 %v2335_v18, %v875_v20 }
 0x960   :  { %v867_v29 = vmul.f32 %v2396_v31, %v866_v27  ;;  %1059 = vmatpush.msra.mxu0 %v2859_v17 }
 0x961   :  { %2133 = vmatmul.msk.f32.vlgmr.msrb.gmra.mxu3 %vm40_vm0, %v878_v28 }
 0x962   :  { %v871_v30 = vsel %vm870_vm5, %v2396_v31, %v867_v29 }
 0x963   :  { %v873_v32 = vmul.f32 %v871_v30, %v839_v60 }
 0x965   :  { %v876_v45 = vmul.f32 %v2334_v8, %v873_v32 }
 0x967   :  { %v879_v33 = vadd.f32 %v2335_v18, %v876_v45  ;;  %v2865_v18 = vld [vmem:[%s3149_s5 + $0x78] sm:$0xff] }
 0x968   :  { %1060 = vmatpush.msra.mxu0 %v2865_v18  ;;  %v2280_v20 = vpack.i.bf16 %v2865_v18, %v2859_v17 }
 0x969   :  { %2134 = vmatmul.msk.f32.gmra.mxu3 %vm40_vm0, %v879_v33 }
 0x9e4   :  { %v904_v25 = vpop.f32.mrf.mxu3 }
 0x9e5   :  { %v905_v40 = vadd.f32 %v2336_v23, %v904_v25 }
 0x9e7   :  { %v910_v41 = vmul.f32 %v905_v40, %v905_v40 }
 0x9e9   :  { %v912_v42 = vmul.f32 %v910_v41, %v905_v40  ;;  %v2339_v41 = vld [vmem:[%s3151_s7 + $0x7] ss:$0 sm:$0xff] }
 0x9eb   :  { %v914_v43 = vmul.f32 0.044715, %v912_v42 }
 0x9ec   :  { %v907_v44 = vpop.f32.mrf.mxu3 }
 0x9ed   :  { %v916_v46 = vadd.f32 %v914_v43, %v905_v40  ;;  %v908_v47 = vadd.f32 %v2336_v23, %v907_v44 }
 0x9ef   :  { %v918_v48 = vmul.f32 0.7978846, %v916_v46  ;;  %v911_v50 = vmul.f32 %v908_v47, %v908_v47 }
 0x9f1   :  { %2397 = vtanh.f32 %v918_v48  ;;  %v913_v51 = vmul.f32 %v911_v50, %v908_v47 }
 0x9f3   :  { %v915_v52 = vmul.f32 0.044715, %v913_v51 }
 0x9f5   :  { %v917_v53 = vadd.f32 %v915_v52, %v908_v47 }
 0x9f7   :  { %v2398_v55 = vpop.eup %2397  ;;  %v919_v56 = vmul.f32 0.7978846, %v917_v53  ;;  %v2340_v53 = vld [vmem:[%s3149_s5 + $0xd8] ss:$0 sm:$0xff] }
 0x9f8   :  { %v922_v57 = vadd.f32 1.0, %v2398_v55 }
 0x9f9   :  { %2399 = vtanh.f32 %v919_v56 }
 0x9fa   :  { %v924_v58 = vmul.f32 0.5, %v922_v57 }
 0x9fc   :  { %v926_v4 = vmul.f32 %v924_v58, %v905_v40 }
 0x9fe   :  { %2135 = vmatmul.msk.f32.vlgmr.msra.gmra.mxu2 %vm938_vm6, %v926_v4 }
 0x9ff   :  { %v2400_v59 = vpop.eup %2399 }
 0xa00   :  { %v923_v60 = vadd.f32 1.0, %v2400_v59 }
 0xa02   :  { %v925_v61 = vmul.f32 0.5, %v923_v60 }
 0xa04   :  { %v927_v62 = vmul.f32 %v925_v61, %v908_v47 }
 0xa06   :  { %2136 = vmatmul.msk.f32.gmra.mxu2 %vm938_vm6, %v927_v62 }
 0xa81   :  { %v962_v63 = vpop.f32.mrf.mxu2 }
 0xa82   :  { %v963_v0 = vadd.f32 %v2337_v13, %v962_v63 }
 0xa84   :  { %v968_v1 = vadd.f32 %v963_v0, %v878_v28 }
 0xa86   :  { %v972_v22 = vsel %vm40_vm0, %v968_v1, 0.0 }
 0xa87   :  { %973 = vadd.xlane.f32.xlu2 %v972_v22 }
 0xa89   :  { %v965_v24 = vpop.f32.mrf.mxu2 }
 0xa8a   :  { %v966_v26 = vadd.f32 %v2337_v13, %v965_v24 }
 0xa8c   :  { %v969_v2 = vadd.f32 %v966_v26, %v879_v33 }
 0xa8e   :  { %v975_v3 = vsel %vm40_vm0, %v969_v2, 0.0 }
 0xa8f   :  { %976 = vadd.xlane.f32.xlu0 %v975_v3 }
 0xafa   :  { %v974_v5 = vpop.xlane.xlu2 %973 }
 0xafb   :  { %v978_v6 = vmul.f32 %v974_v5, %v2561_v10 }
 0xafd   :  { %v980_v7 = vsub.f32 %v968_v1, %v978_v6 }
 0xaff   :  { %v982_v11 = vmul.f32 %v980_v7, %v980_v7 }
 0xb01   :  { %v984_v12 = vsel %vm40_vm0, %v982_v11, 0.0  ;;  %v2464_v11 = vld [vmem:[%s3145_s1 + $0x8] sm:$0xff] }
 0xb02   :  { %985 = vadd.xlane.f32.xlu2 %v984_v12  ;;  %v977_v9 = vpop.xlane.xlu0 %976 }
 0xb03   :  { %v979_v31 = vmul.f32 %v977_v9, %v2561_v10 }
 0xb05   :  { %v981_v14 = vsub.f32 %v969_v2, %v979_v31  ;;  %v2463_v2 = vld [vmem:[%s3145_s1] sm:$0xff] }
 0xb07   :  { %v983_v15 = vmul.f32 %v981_v14, %v981_v14 }
 0xb09   :  { %v987_v8 = vsel %vm40_vm0, %v983_v15, 0.0 }
 0xb0a   :  { %988 = vadd.xlane.f32.xlu0 %v987_v8 }
 0xb75   :  { %v986_v27 = vpop.xlane.xlu2 %985 }
 0xb76   :  { %v990_v28 = vmul.f32 %v986_v27, %v2561_v10 }
 0xb78   :  { %v992_v29 = vadd.f32 1e-05, %v990_v28 }
 0xb7a   :  { %2401 = vrsqrt.f32 %v992_v29  ;;  %vm1000_vm9 = vweird.f32 %v992_v29 }
 0xb7d   :  { %v989_v30 = vpop.xlane.xlu0 %988 }
 0xb7e   :  { %v991_v32 = vmul.f32 %v989_v30, %v2561_v10 }
 0xb80   :  { %v2402_v45 = vpop.eup %2401  ;;  %v993_v33 = vadd.f32 1e-05, %v991_v32 }
 0xb81   :  { %v995_v54 = vmul.f32 %v2402_v45, %v992_v29  ;;  %vm1001_vm7 = vweird.f32 %v2402_v45 }
 0xb82   :  { %2403 = vrsqrt.f32 %v993_v33  ;;  %vm1002_vm10 = vmor %vm1000_vm9, %vm1001_vm7  ;;  %vm1010_vm12 = vweird.f32 %v993_v33 }
 0xb83   :  { %v996_v34 = vmul.f32 %v2402_v45, %v995_v54 }
 0xb85   :  { %v997_v35 = vmul.f32 0.5, %v996_v34 }
 0xb87   :  { %v998_v36 = vsub.f32 1.5, %v997_v35 }
 0xb88   :  { %v2404_v37 = vpop.eup %2403 }
 0xb89   :  { %v999_v38 = vmul.f32 %v2402_v45, %v998_v36  ;;  %v1005_v39 = vmul.f32 %v2404_v37, %v993_v33  ;;  %vm1011_vm11 = vweird.f32 %v2404_v37 }
 0xb8a   :  { %vm1012_vm13 = vmor %vm1010_vm12, %vm1011_vm11 }
 0xb8b   :  { %v1003_v23 = vsel %vm1002_vm10, %v2402_v45, %v999_v38  ;;  %v1006_v25 = vmul.f32 %v2404_v37, %v1005_v39 }
 0xb8c   :  { %v1014_v40 = vmul.f32 %v1003_v23, %v980_v7 }
 0xb8d   :  { %v1007_v42 = vmul.f32 0.5, %v1006_v25 }
 0xb8e   :  { %v1017_v43 = vmul.f32 %v2338_v21, %v1014_v40 }
 0xb8f   :  { %v1008_v44 = vsub.f32 1.5, %v1007_v42 }
 0xb90   :  { %v2880_v46 = vadd.f32 %v2339_v41, %v1017_v43 }
 0xb91   :  { %v1009_v47 = vmul.f32 %v2404_v37, %v1008_v44 }
 0xb92   :  { %2152 = vmatmul.msk.f32.vlgmr.msra.gmra.mxu0 %vm40_vm0, %v2880_v46 }
 0xb93   :  { %v1013_v48 = vsel %vm1012_vm13, %v2404_v37, %v1009_v47 }
 0xb94   :  { %v1015_v50 = vmul.f32 %v1013_v48, %v981_v14 }
 0xb96   :  { %v1018_v51 = vmul.f32 %v2338_v21, %v1015_v50 }
 0xb98   :  { %v2884_v52 = vadd.f32 %v2339_v41, %v1018_v51 }
 0xb9a   :  { %2153 = vmatmul.msk.f32.gmra.mxu0 %vm40_vm0, %v2884_v52 }
 0xc0f   :  { %v1062_v55 = vpop.f32.mrf.mxu0 }
 0xc10   :  { %v1063_v56 = vadd.f32 %v2340_v53, %v1062_v55 }
 0xc12   :  { %1070 = vrot.lane.b32.xlu0 %v1063_v56, %s2497_s24 }
 0xc17   :  { %v1065_v57 = vpop.f32.mrf.mxu0 }
 0xc18   :  { %v1066_v58 = vadd.f32 %v2340_v53, %v1065_v57 }
 0xc1a   :  { %1170 = vrot.lane.b32.xlu0 %v1063_v56, %s2496_s23  ;;  %1172 = vrot.lane.b32.xlu1 %v1066_v58, %s2496_s23  ;;  %v2270_v4 = vpack.i.bf16 %v1063_v56, %v1066_v58 }
 0xc1b   :  { %1072 = vrot.lane.b32.xlu2 %v1066_v58, %s2497_s24 }
 0xc22   :  { %1168 = vrot.lane.b32.xlu0 %v1066_v58, %s2499_s26 }
 0xc23   :  { %1166 = vrot.lane.b32.xlu2 %v1063_v56, %s2499_s26 }
 0xc2a   :  { %2271 = vrot.lane.b32.xlu0 %v2270_v4, %s2498_s25 }
 0xc75   :  { %v1073_v59 = vpop.permute.xlu2 %1072 }
 0xc76   :  { %2154 = vmatpush.xpose.msk.msra.mxu1 %vm149_vm8, %v1073_v59 }
 0xc7d   :  { %v1167_v13 = vpop.permute.xlu2 %1166 }
 0xc84   :  { %v1071_v60 = vpop.permute.xlu0 %1070 }
 0xc85   :  { %2155 = vmatpush.xpose.msk.msra.mxu1 %vm149_vm8, %v1071_v60 }
 0xc88   :  { %2156 = vmatmul.msk.f32.vlgmr.msra.gmra.mxu1 %vm149_vm8, %v1063_v56 }
 0xc8c   :  { %v1173_v61 = vpop.permute.xlu1 %1172  ;;  %v1171_v62 = vpop.permute.xlu0 %1170 }
 0xc8d   :  { %2160 = vmatpush.xpose.msk.msrb.mxu2 %vm149_vm8, %v1173_v61 }
 0xc90   :  { %2157 = vmatmul.msk.f32.gmra.mxu1 %vm149_vm8, %v1066_v58 }
 0xc91   :  { %2161 = vmatpush.xpose.msk.msrb.mxu2 %vm149_vm8, %v1171_v62 }
 0xc94   :  { %2162 = vmatmul.msk.f32.vlgmr.msrb.gmra.mxu2 %vm149_vm8, %v1167_v13  ;;  %v1169_v63 = vpop.permute.xlu0 %1168 }
 0xc9c   :  { %2163 = vmatmul.msk.f32.gmra.mxu2 %vm149_vm8, %v1169_v63  ;;  %v2272_v0 = vpop.permute.xlu0 %2271 }
 0xc9d   :  { %v2273_v1 = vunpack.i.l.bf16 %v2272_v0  ;;  %v2274_v22 = vunpack.i.h.bf16 %v2272_v0 }
 0xc9f   :  { %1153 = vmatpush.msra.mxu3 %v2273_v1 }
 0xca1   :  { %1154 = vmatpush.msra.mxu3 %v2274_v22 }
 0xd05   :  { %v1099_v24 = vpop.f32.mrf.mxu1 }
 0xd06   :  { %v1105_v26 = vmul.f32 0.25, %v1099_v24 }
 0xd08   :  { %v1107_v3 = vadd.f32 %v2463_v2, %v1105_v26 }
 0xd0a   :  { %v1109_v5 = vsel %vm149_vm8, %v1107_v3, -inf }
 0xd0b   :  { %1110 = vmax.xlane.f32.xlu2 %v1109_v5 }
 0xd0d   :  { %v1102_v6 = vpop.f32.mrf.mxu1 }
 0xd0e   :  { %v1106_v7 = vmul.f32 0.25, %v1102_v6 }
 0xd10   :  { %v1108_v12 = vadd.f32 %v2464_v11, %v1106_v7 }
 0xd12   :  { %v1112_v9 = vsel %vm149_vm8, %v1108_v12, -inf }
 0xd13   :  { %1113 = vmax.xlane.f32.xlu1 %v1112_v9 }
 0xd17   :  { %v1199_v31 = vpop.f32.mrf.mxu2 }
 0xd18   :  { %v1205_v14 = vmul.f32 0.25, %v1199_v31 }
 0xd1a   :  { %v1207_v15 = vadd.f32 %v2463_v2, %v1205_v14 }
 0xd1c   :  { %v1209_v8 = vsel %vm149_vm8, %v1207_v15, -inf }
 0xd1d   :  { %1210 = vmax.xlane.f32.xlu0 %v1209_v8 }
 0xd1f   :  { %v1202_v27 = vpop.f32.mrf.mxu2 }
 0xd20   :  { %v1206_v28 = vmul.f32 0.25, %v1202_v27 }
 0xd22   :  { %v1208_v29 = vadd.f32 %v2464_v11, %v1206_v28  ;;  %v2138_v28 = vld [vmem:[%s3149_s5 + $0x80] sm:$0xff] }
 0xd24   :  { %v1212_v30 = vsel %vm149_vm8, %v1208_v29, -inf }
 0xd25   :  { %1213 = vmax.xlane.f32.xlu2 %v1212_v30  ;;  %v2147_v30 = vld [vmem:[%s3149_s5 + $0xc8] sm:$0xff] }
 0xd26   :  { %1419 = vmatpush.msra.mxu2 %v2147_v30 }
 0xd2c   :  { %2276 = vrot.lane.b32.xlu1 %v2270_v4, %s2500_s9 }
 0xd31   :  { %2281 = vrot.lane.b32.xlu0 %v2280_v20, %s2501_s10 }
 0xd34   :  { %2286 = vrot.lane.b32.xlu1 %v2285_v19, %s2501_s10 }
 0xd3c   :  { %1341 = vrot.lane.b32.xlu1 %v2340_v53, %s2501_s10 }
 0xd7e   :  { %v1111_v32 = vpop.xlane.xlu2 %1110 }
 0xd7f   :  { %v1115_v45 = vsub.f32 %v1107_v3, %v1111_v32 }
 0xd81   :  { %v1117_v33 = vmul.f32 1.442695, %v1115_v45 }
 0xd83   :  { %2405 = vpow2.f32 %v1117_v33 }
 0xd86   :  { %v1114_v54 = vpop.xlane.xlu1 %1113 }
 0xd87   :  { %v1116_v34 = vsub.f32 %v1108_v12, %v1114_v54 }
 0xd89   :  { %v2406_v35 = vpop.eup %2405  ;;  %v1119_v36 = vmul.f32 1.442695, %v1116_v34 }
 0xd8a   :  { %2158 = vmatmul.msk.f32.vlgmr.msra.gmra.mxu3 %vm149_vm8, %v2406_v35  ;;  %v1121_v17 = vsel %vm149_vm8, %v2406_v35, 0.0 }
 0xd8b   :  { %2407 = vpow2.f32 %v1119_v36  ;;  %1122 = vadd.xlane.f32.xlu2 %v1121_v17 }
 0xd90   :  { %v1211_v18 = vpop.xlane.xlu0 %1210 }
 0xd91   :  { %v2408_v20 = vpop.eup %2407  ;;  %v1215_v49 = vsub.f32 %v1207_v15, %v1211_v18 }
 0xd92   :  { %2159 = vmatmul.msk.f32.gmra.mxu3 %vm149_vm8, %v2408_v20  ;;  %v1124_v41 = vsel %vm149_vm8, %v2408_v20, 0.0 }
 0xd93   :  { %v1217_v16 = vmul.f32 1.442695, %v1215_v49 }
 0xd95   :  { %2409 = vpow2.f32 %v1217_v16 }
 0xd98   :  { %v1214_v19 = vpop.xlane.xlu2 %1213 }
 0xd99   :  { %v1216_v38 = vsub.f32 %v1208_v29, %v1214_v19 }
 0xd9b   :  { %v2410_v37 = vpop.eup %2409  ;;  %v1219_v23 = vmul.f32 1.442695, %v1216_v38  ;;  %v2970_v38 = vld [vmem:[%s3149_s5 + $0xe0] ss:$0 sm:$0xff] }
 0xd9c   :  { %v1221_v39 = vsel %vm149_vm8, %v2410_v37, 0.0 }
 0xd9d   :  { %1222 = vadd.xlane.f32.xlu2 %v1221_v39  ;;  %2411 = vpow2.f32 %v1219_v23 }
 0xd9e   :  { %v2277_v21 = vpop.permute.xlu1 %2276 }
 0xd9f   :  { %v2278_v25 = vunpack.i.l.bf16 %v2277_v21  ;;  %v2279_v40 = vunpack.i.h.bf16 %v2277_v21 }
 0xda1   :  { %1253 = vmatpush.msrb.mxu0 %v2278_v25 }
 0xda3   :  { %1254 = vmatpush.msrb.mxu0 %v2279_v40  ;;  %v2412_v42 = vpop.eup %2411  ;;  %v2282_v44 = vpop.permute.xlu0 %2281 }
 0xda4   :  { %2164 = vmatmul.msk.f32.vlgmr.msrb.gmra.mxu0 %vm149_vm8, %v2410_v37  ;;  %v1224_v43 = vsel %vm149_vm8, %v2412_v42, 0.0  ;;  %v2284_v47 = vunpack.i.h.bf16 %v2282_v44  ;;  %v2283_v48 = vunpack.i.l.bf16 %v2282_v44 }
 0xda5   :  { %1125 = vadd.xlane.f32.xlu2 %v1124_v41 }
 0xda6   :  { %1331 = vmatpush.msrb.mxu3 %v2283_v48  ;;  %v2287_v50 = vpop.permute.xlu1 %2286 }
 0xda7   :  { %v2289_v51 = vunpack.i.h.bf16 %v2287_v50  ;;  %v2288_v53 = vunpack.i.l.bf16 %v2287_v50 }
 0xda8   :  { %1332 = vmatpush.msrb.mxu3 %v2284_v47 }
 0xda9   :  { %1294 = vmatpush.msrb.mxu1 %v2288_v53 }
 0xdab   :  { %1295 = vmatpush.msrb.mxu1 %v2289_v51 }
 0xdac   :  { %2165 = vmatmul.msk.f32.gmra.mxu0 %vm149_vm8, %v2412_v42 }
 0xdad   :  { %1225 = vadd.xlane.f32.xlu2 %v1224_v43 }
 0xdae   :  { %v1342_v2 = vpop.permute.xlu1 %1341 }
 0xdfe   :  { %v1123_v55 = vpop.xlane.xlu2 %1122 }
 0xdff   :  { %2413 = vrcp.f32 %v1123_v55 }
 0xe05   :  { %v2414_v56 = vpop.eup %2413 }
 0xe0d   :  { %v1156_v57 = vpop.f32.mrf.mxu3 }
 0xe0e   :  { %v1164_v58 = vmul.f32 %v2414_v56, %v1156_v57  ;;  %v2341_v57 = vld [vmem:[%s3151_s7 + $0x9] ss:$0 sm:$0xff] }
 0xe10   :  { %v1223_v4 = vpop.xlane.xlu2 %1222  ;;  %2168 = vmatmul.msk.f32.vlgmr.msrb.gmra.mxu3 %vm149_vm8, %v1164_v58 }
 0xe15   :  { %v1159_v61 = vpop.f32.mrf.mxu3 }
 0xe18   :  { %v1126_v59 = vpop.xlane.xlu2 %1125 }
 0xe19   :  { %2415 = vrcp.f32 %v1126_v59 }
 0xe1a   :  { %2417 = vrcp.f32 %v1223_v4 }
 0xe1f   :  { %v2416_v60 = vpop.eup %2415 }
 0xe20   :  { %v1226_v62 = vpop.xlane.xlu2 %1225  ;;  %v1165_v13 = vmul.f32 %v2416_v60, %v1159_v61  ;;  %v2418_v63 = vpop.eup %2417  ;;  %v2342_v61 = vld [vmem:[%s3151_s7 + $0xa] ss:$0 sm:$0xff] }
 0xe21   :  { %v1256_v0 = vpop.f32.mrf.mxu0  ;;  %2419 = vrcp.f32 %v1226_v62 }
 0xe22   :  { %v1264_v1 = vmul.f32 %v2418_v63, %v1256_v0  ;;  %2169 = vmatmul.msk.f32.gmra.mxu3 %vm149_vm8, %v1165_v13  ;;  %v2465_v0 = vld [vmem:[%s3144_s0 + $0x10] sm:$0xff] }
 0xe24   :  { %2166 = vmatmul.msk.f32.vlgmr.msrb.gmra.mxu1 %vm149_vm8, %v1264_v1 }
 0xe27   :  { %v2420_v22 = vpop.eup %2419 }
 0xe29   :  { %v1259_v24 = vpop.f32.mrf.mxu0 }
 0xe2a   :  { %v1265_v26 = vmul.f32 %v2420_v22, %v1259_v24 }
 0xe2c   :  { %2167 = vmatmul.msk.f32.gmra.mxu1 %vm149_vm8, %v1265_v26 }
 0xe93   :  { %v1334_v3 = vpop.f32.mrf.mxu3 }
 0xea1   :  { %v1297_v5 = vpop.f32.mrf.mxu1 }
 0xea2   :  { %v1335_v6 = vadd.f32 %v1334_v3, %v1297_v5  ;;  %v2466_v3 = vld [vmem:[%s3144_s0 + $0x18] sm:$0xff] }
 0xea4   :  { %v1344_v7 = vadd.f32 %v1342_v2, %v1335_v6 }
 0xea5   :  { %v1337_v9 = vpop.f32.mrf.mxu3 }
 0xea6   :  { %v1346_v11 = vadd.f32 %v1344_v7, %v2880_v46  ;;  %v2141_v46 = vld [vmem:[%s3149_s5 + $0x98] sm:$0xff] }
 0xea7   :  { %v2948_v29 = vpack.i.bf16 %v2138_v28, %v2141_v46 }
 0xea8   :  { %v1350_v12 = vsel %vm40_vm0, %v1346_v11, 0.0 }
 0xea9   :  { %v1300_v31 = vpop.f32.mrf.mxu1  ;;  %1351 = vadd.xlane.f32.xlu0 %v1350_v12 }
 0xeaa   :  { %v1338_v14 = vadd.f32 %v1337_v9, %v1300_v31 }
 0xeac   :  { %v1345_v15 = vadd.f32 %v1342_v2, %v1338_v14 }
 0xeae   :  { %v1347_v8 = vadd.f32 %v1345_v15, %v2884_v52  ;;  %v2144_v52 = vld [vmem:[%s3149_s5 + $0xb0] sm:$0xff] }
 0xeaf   :  { %1420 = vmatpush.msra.mxu2 %v2144_v52  ;;  %v2962_v49 = vpack.i.bf16 %v2144_v52, %v2147_v30 }
 0xeb0   :  { %v1353_v27 = vsel %vm40_vm0, %v1347_v8, 0.0 }
 0xeb1   :  { %1354 = vadd.xlane.f32.xlu2 %v1353_v27  ;;  %1421 = vmatpush.msra.mxu2 %v2141_v46 }
 0xeb3   :  { %1422 = vmatpush.msra.mxu2 %v2138_v28 }
 0xebd   :  { %2296 = vrot.lane.b32.xlu0 %v2948_v29, %s2497_s24 }
 0xf1c   :  { %v1352_v32 = vpop.xlane.xlu0 %1351 }
 0xf1d   :  { %v1356_v45 = vmul.f32 %v1352_v32, %v2561_v10 }
 0xf1f   :  { %v1358_v33 = vsub.f32 %v1346_v11, %v1356_v45 }
 0xf21   :  { %v1360_v54 = vmul.f32 %v1358_v33, %v1358_v33 }
 0xf23   :  { %v1362_v34 = vsel %vm40_vm0, %v1360_v54, 0.0 }
 0xf24   :  { %1363 = vadd.xlane.f32.xlu1 %v1362_v34  ;;  %v1355_v35 = vpop.xlane.xlu2 %1354 }
 0xf25   :  { %v1357_v36 = vmul.f32 %v1355_v35, %v2561_v10  ;;  %v2467_v35 = vld [vmem:[%s3146_s2] sm:$0xff] }
 0xf27   :  { %v1359_v17 = vsub.f32 %v1347_v8, %v1357_v36 }
 0xf29   :  { %v1361_v18 = vmul.f32 %v1359_v17, %v1359_v17 }
 0xf2b   :  { %v1365_v20 = vsel %vm40_vm0, %v1361_v18, 0.0 }
 0xf2c   :  { %1366 = vadd.xlane.f32.xlu2 %v1365_v20 }
 0xf2f   :  { %v2297_v44 = vpop.permute.xlu0 %2296 }
 0xf30   :  { %v2298_v53 = vunpack.i.l.bf16 %v2297_v44  ;;  %v2299_v60 = vunpack.i.h.bf16 %v2297_v44 }
 0xf44   :  { %2291 = vrot.lane.b32.xlu2 %v2962_v49, %s2497_s24 }
 0xf4c   :  { %1447 = vrot.lane.b32.xlu2 %v2970_v38, %s2497_s24 }
 0xf97   :  { %v1364_v16 = vpop.xlane.xlu1 %1363 }
 0xf98   :  { %v1368_v19 = vmul.f32 %v1364_v16, %v2561_v10  ;;  %v2468_v16 = vld [vmem:[%s3146_s2 + $0x8] sm:$0xff] }
 0xf9a   :  { %v1370_v37 = vadd.f32 1e-05, %v1368_v19 }
 0xf9c   :  { %2421 = vrsqrt.f32 %v1370_v37  ;;  %vm1378_vm15 = vweird.f32 %v1370_v37 }
 0xf9f   :  { %v1367_v39 = vpop.xlane.xlu2 %1366 }
 0xfa0   :  { %v1369_v21 = vmul.f32 %v1367_v39, %v2561_v10 }
 0xfa2   :  { %v2422_v23 = vpop.eup %2421  ;;  %v1371_v25 = vadd.f32 1e-05, %v1369_v21 }
 0xfa3   :  { %v1373_v40 = vmul.f32 %v2422_v23, %v1370_v37  ;;  %vm1379_vm14 = vweird.f32 %v2422_v23 }
 0xfa4   :  { %2423 = vrsqrt.f32 %v1371_v25  ;;  %vm1380_vm1 = vmor %vm1378_vm15, %vm1379_vm14  ;;  %vm1388_vm3 = vweird.f32 %v1371_v25 }
 0xfa5   :  { %v1374_v41 = vmul.f32 %v2422_v23, %v1373_v40 }
 0xfa7   :  { %v1375_v42 = vmul.f32 0.5, %v1374_v41  ;;  %v2292_v43 = vpop.permute.xlu2 %2291 }
 0xfa8   :  { %v2293_v47 = vunpack.i.l.bf16 %v2292_v43  ;;  %v2294_v51 = vunpack.i.h.bf16 %v2292_v43 }
 0xfa9   :  { %v1376_v48 = vsub.f32 1.5, %v1375_v42 }
 0xfaa   :  { %v2424_v50 = vpop.eup %2423  ;;  %1462 = vmatpush.msra.mxu0 %v2293_v47 }
 0xfab   :  { %v1377_v55 = vmul.f32 %v2422_v23, %v1376_v48  ;;  %v1383_v56 = vmul.f32 %v2424_v50, %v1371_v25  ;;  %vm1389_vm2 = vweird.f32 %v2424_v50 }
 0xfac   :  { %1463 = vmatpush.msra.mxu0 %v2294_v51  ;;  %vm1390_vm4 = vmor %vm1388_vm3, %vm1389_vm2 }
 0xfad   :  { %v1381_v58 = vsel %vm1380_vm1, %v2422_v23, %v1377_v55  ;;  %v1384_v4 = vmul.f32 %v2424_v50, %v1383_v56 }
 0xfae   :  { %v1392_v59 = vmul.f32 %v1381_v58, %v1358_v33  ;;  %1464 = vmatpush.msra.mxu0 %v2298_v53 }
 0xfaf   :  { %v1385_v62 = vmul.f32 0.5, %v1384_v4  ;;  %v1448_v6 = vpop.permute.xlu2 %1447 }
 0xfb0   :  { %v1395_v13 = vmul.f32 %v2341_v57, %v1392_v59  ;;  %1465 = vmatpush.msra.mxu0 %v2299_v60 }
 0xfb1   :  { %v1386_v63 = vsub.f32 1.5, %v1385_v62  ;;  %2172 = vmatmul.msk.f32.vlgmr.msra.gmra.mxu0 %vm40_vm0, %v2465_v0 }
 0xfb2   :  { %v2985_v1 = vadd.f32 %v2342_v61, %v1395_v13 }
 0xfb3   :  { %v1387_v22 = vmul.f32 %v2424_v50, %v1386_v63 }
 0xfb4   :  { %2170 = vmatmul.msk.f32.vlgmr.msra.gmra.mxu2 %vm40_vm0, %v2985_v1 }
 0xfb5   :  { %v1391_v24 = vsel %vm1390_vm4, %v2424_v50, %v1387_v22 }
 0xfb6   :  { %v1393_v26 = vmul.f32 %v1391_v24, %v1359_v17 }
 0xfb8   :  { %v1396_v2 = vmul.f32 %v2341_v57, %v1393_v26 }
 0xfb9   :  { %2173 = vmatmul.msk.f32.gmra.mxu0 %vm40_vm0, %v2466_v3 }
 0xfba   :  { %v2993_v5 = vadd.f32 %v2342_v61, %v1396_v2 }
 0xfbc   :  { %2171 = vmatmul.msk.f32.gmra.mxu2 %vm40_vm0, %v2993_v5 }
0x102e   :  { %v1467_v7 = vpop.f32.mrf.mxu0 }
0x102f   :  { %v1468_v11 = vadd.f32 %v1467_v7, %v1448_v6 }
0x1031   :  { %1573 = vrot.lane.b32.xlu2 %v1468_v11, %s2499_s26 }
0x1036   :  { %v1470_v12 = vpop.f32.mrf.mxu0 }
0x1037   :  { %v1471_v9 = vadd.f32 %v1470_v12, %v1448_v6  ;;  %v1424_v31 = vpop.f32.mrf.mxu2 }
0x1038   :  { %v1425_v14 = vadd.f32 %v2970_v38, %v1424_v31 }
0x1039   :  { %1575 = vrot.lane.b32.xlu1 %v1471_v9, %s2499_s26  ;;  %2174 = vmatpush.xpose.msk.msra.mxu1 %vm149_vm8, %v1471_v9  ;;  %v2305_v15 = vpack.i.bf16 %v1468_v11, %v1471_v9 }
0x103a   :  { %1569 = vrot.lane.b32.xlu2 %v1425_v14, %s2499_s26 }
0x103d   :  { %2175 = vmatpush.xpose.msk.msra.mxu1 %vm149_vm8, %v1468_v11 }
0x103f   :  { %v1427_v8 = vpop.f32.mrf.mxu2 }
0x1040   :  { %v1428_v27 = vadd.f32 %v2970_v38, %v1427_v8  ;;  %2176 = vmatmul.msk.f32.vlgmr.msra.gmra.mxu1 %vm149_vm8, %v1425_v14 }
0x1041   :  { %2301 = vrot.lane.b32.xlu1 %v2305_v15, %s2497_s24  ;;  %s2504_s24 = smov 1  }
0x1042   :  { %1571 = vrot.lane.b32.xlu0 %v1428_v27, %s2499_s26 }
0x1048   :  { %2177 = vmatmul.msk.f32.gmra.mxu1 %vm149_vm8, %v1428_v27 }
0x108b   :  { %v1574_v28 = vpop.permute.xlu2 %1573 }
0x1094   :  { %v1570_v30 = vpop.permute.xlu2 %1569 }
0x10ab   :  { %v1576_v46 = vpop.permute.xlu1 %1575 }
0x10ac   :  { %2180 = vmatpush.xpose.msk.msrb.mxu2 %vm149_vm8, %v1576_v46 }
0x10b0   :  { %2181 = vmatpush.xpose.msk.msrb.mxu2 %vm149_vm8, %v1574_v28 }
0x10b3   :  { %v2302_v52 = vpop.permute.xlu1 %2301  ;;  %2182 = vmatmul.msk.f32.vlgmr.msrb.gmra.mxu2 %vm149_vm8, %v1570_v30 }
0x10b4   :  { %v2303_v32 = vunpack.i.l.bf16 %v2302_v52  ;;  %v2304_v45 = vunpack.i.h.bf16 %v2302_v52  ;;  %v1572_v33 = vpop.permute.xlu0 %1571 }
0x10b6   :  { %1556 = vmatpush.msra.mxu3 %v2303_v32 }
0x10b8   :  { %1557 = vmatpush.msra.mxu3 %v2304_v45 }
0x10bb   :  { %2183 = vmatmul.msk.f32.gmra.mxu2 %vm149_vm8, %v1572_v33 }
0x10bd   :  { %v1502_v54 = vpop.f32.mrf.mxu1 }
0x10be   :  { %v1508_v34 = vmul.f32 0.25, %v1502_v54 }
0x10c0   :  { %v1510_v36 = vadd.f32 %v2467_v35, %v1508_v34 }
0x10c2   :  { %v1512_v17 = vsel %vm149_vm8, %v1510_v36, -inf }
0x10c3   :  { %1513 = vmax.xlane.f32.xlu2 %v1512_v17 }
0x10c5   :  { %v1505_v18 = vpop.f32.mrf.mxu1 }
0x10c6   :  { %v1509_v20 = vmul.f32 0.25, %v1505_v18 }
0x10c8   :  { %v1511_v19 = vadd.f32 %v2468_v16, %v1509_v20 }
0x10ca   :  { %v1515_v37 = vsel %vm149_vm8, %v1511_v19, -inf }
0x10cb   :  { %1516 = vmax.xlane.f32.xlu0 %v1515_v37 }
0x10df   :  { %2306 = vrot.lane.b32.xlu0 %v2305_v15, %s2496_s23  ;;  %s2086_s23 = sshll.u32 %s3152_s8, 4  ;;  %s2087_s23 = int_to_ptr.hbm [resolvable:$true] %s2086_s23 }
0x10e7   :  { %2316 = vrot.lane.b32.xlu0 %v2962_v49, %s2501_s10 }
0x10ef   :  { %1739 = vrot.lane.b32.xlu0 %v2970_v38, %s2501_s10 }
0x1136   :  { %v1602_v39 = vpop.f32.mrf.mxu2  ;;  %v1514_v21 = vpop.xlane.xlu2 %1513 }
0x1137   :  { %v1608_v23 = vmul.f32 0.25, %v1602_v39  ;;  %v1518_v25 = vsub.f32 %v1510_v36, %v1514_v21 }
0x1139   :  { %v1520_v40 = vmul.f32 1.442695, %v1518_v25  ;;  %v1610_v41 = vadd.f32 %v2467_v35, %v1608_v23 }
0x113b   :  { %2425 = vpow2.f32 %v1520_v40  ;;  %v1612_v42 = vsel %vm149_vm8, %v1610_v41, -inf }
0x113c   :  { %1613 = vmax.xlane.f32.xlu1 %v1612_v42 }
0x113e   :  { %v1605_v43 = vpop.f32.mrf.mxu2  ;;  %v1517_v44 = vpop.xlane.xlu0 %1516 }
0x113f   :  { %v1609_v47 = vmul.f32 0.25, %v1605_v43  ;;  %v1519_v48 = vsub.f32 %v1511_v19, %v1517_v44 }
0x1141   :  { %v2426_v50 = vpop.eup %2425  ;;  %v1522_v51 = vmul.f32 1.442695, %v1519_v48  ;;  %v1611_v53 = vadd.f32 %v2468_v16, %v1609_v47 }
0x1142   :  { %2178 = vmatmul.msk.f32.vlgmr.msra.gmra.mxu3 %vm149_vm8, %v2426_v50  ;;  %v1524_v58 = vsel %vm149_vm8, %v2426_v50, 0.0 }
0x1143   :  { %2427 = vpow2.f32 %v1522_v51  ;;  %v1615_v55 = vsel %vm149_vm8, %v1611_v53, -inf }
0x1144   :  { %1616 = vmax.xlane.f32.xlu2 %v1615_v55  ;;  %v2145_v55 = vld [vmem:[%s3149_s5 + $0xb8] sm:$0xff] }
0x1149   :  { %v2428_v56 = vpop.eup %2427 }
0x114a   :  { %2179 = vmatmul.msk.f32.gmra.mxu3 %vm149_vm8, %v2428_v56  ;;  %v1527_v57 = vsel %vm149_vm8, %v2428_v56, 0.0  ;;  %v2142_v56 = vld [vmem:[%s3149_s5 + $0xa0] sm:$0xff] }
0x114b   :  { %1528 = vadd.xlane.f32.xlu1 %v1527_v57  ;;  %v2139_v57 = vld [vmem:[%s3149_s5 + $0x88] sm:$0xff] }
0x114c   :  { %1525 = vadd.xlane.f32.xlu2 %v1524_v58 }
0x1151   :  { %v2307_v4 = vpop.permute.xlu0 %2306 }
0x1152   :  { %v2308_v59 = vunpack.i.l.bf16 %v2307_v4  ;;  %v2309_v60 = vunpack.i.h.bf16 %v2307_v4 }
0x1154   :  { %1656 = vmatpush.msrb.mxu0 %v2308_v59 }
0x1156   :  { %1657 = vmatpush.msrb.mxu0 %v2309_v60 }
0x1159   :  { %v2317_v8 = vpop.permute.xlu0 %2316 }
0x115a   :  { %v2319_v27 = vunpack.i.h.bf16 %v2317_v8  ;;  %v2318_v28 = vunpack.i.l.bf16 %v2317_v8 }
0x115c   :  { %1695 = vmatpush.msrb.mxu1 %v2318_v28 }
0x115e   :  { %1696 = vmatpush.msrb.mxu1 %v2319_v27 }
0x1161   :  { %v1740_v17 = vpop.permute.xlu0 %1739 }
0x1164   :  { %2311 = vrot.lane.b32.xlu2 %v2948_v29, %s2501_s10 }
0x11af   :  { %v1614_v61 = vpop.xlane.xlu1 %1613 }
0x11b0   :  { %v1618_v62 = vsub.f32 %v1610_v41, %v1614_v61 }
0x11b2   :  { %v1620_v13 = vmul.f32 1.442695, %v1618_v62 }
0x11b4   :  { %2429 = vpow2.f32 %v1620_v13 }
0x11b7   :  { %v1617_v63 = vpop.xlane.xlu2 %1616 }
0x11b8   :  { %v1619_v0 = vsub.f32 %v1611_v53, %v1617_v63 }
0x11ba   :  { %v2430_v22 = vpop.eup %2429  ;;  %v1622_v24 = vmul.f32 1.442695, %v1619_v0 }
0x11bb   :  { %2184 = vmatmul.msk.f32.vlgmr.msrb.gmra.mxu0 %vm149_vm8, %v2430_v22  ;;  %v1624_v26 = vsel %vm149_vm8, %v2430_v22, 0.0 }
0x11bc   :  { %2431 = vpow2.f32 %v1622_v24  ;;  %1625 = vadd.xlane.f32.xlu1 %v1624_v26 }
0x11be   :  { %v1529_v12 = vpop.xlane.xlu1 %1528 }
0x11bf   :  { %v1526_v29 = vpop.xlane.xlu2 %1525 }
0x11c0   :  { %2433 = vrcp.f32 %v1526_v29 }
0x11c1   :  { %2435 = vrcp.f32 %v1529_v12 }
0x11c2   :  { %v2432_v2 = vpop.eup %2431 }
0x11c3   :  { %2185 = vmatmul.msk.f32.gmra.mxu0 %vm149_vm8, %v2432_v2  ;;  %v1627_v49 = vsel %vm149_vm8, %v2432_v2, 0.0 }
0x11c4   :  { %1628 = vadd.xlane.f32.xlu1 %v1627_v49  ;;  %v2344_v49 = vld [vmem:[%s3151_s7 + $0xb] ss:$0 sm:$0xff] }
0x11c5   :  { %v1559_v38 = vpop.f32.mrf.mxu3 }
0x11c6   :  { %v2434_v6 = vpop.eup %2433 }
0x11c7   :  { %v2312_v3 = vpop.permute.xlu2 %2311  ;;  %v1567_v9 = vmul.f32 %v2434_v6, %v1559_v38  ;;  %v2436_v14 = vpop.eup %2435 }
0x11c8   :  { %v2314_v7 = vunpack.i.h.bf16 %v2312_v3  ;;  %v2313_v11 = vunpack.i.l.bf16 %v2312_v3 }
0x11ca   :  { %1730 = vmatpush.msrb.mxu3 %v2313_v11 }
0x11cc   :  { %1731 = vmatpush.msrb.mxu3 %v2314_v7  ;;  %v2345_v7 = vld [vmem:[%s3151_s7 + $0xc] ss:$0 sm:$0xff] }
0x11cd   :  { %2188 = vmatmul.msk.f32.vlgmr.msrb.gmra.mxu3 %vm149_vm8, %v1567_v9  ;;  %v1562_v31 = vpop.f32.mrf.mxu3 }
0x11ce   :  { %v1568_v15 = vmul.f32 %v2436_v14, %v1562_v31 }
0x11d5   :  { %2189 = vmatmul.msk.f32.gmra.mxu3 %vm149_vm8, %v1568_v15 }
0x122f   :  { %v1626_v46 = vpop.xlane.xlu1 %1625 }
0x1230   :  { %2437 = vrcp.f32 %v1626_v46  ;;  %v2199_v46 = vld [vmem:[%s3150_s6 + $0x78] sm:$0xff] }
0x1231   :  { %1871 = vmatpush.msra.mxu0 %v2199_v46 }
0x1236   :  { %v2438_v52 = vpop.eup %2437 }
0x1237   :  { %v1629_v30 = vpop.xlane.xlu1 %1628 }
0x1238   :  { %v1659_v32 = vpop.f32.mrf.mxu0  ;;  %2439 = vrcp.f32 %v1629_v30  ;;  %v2198_v30 = vld [vmem:[%s3150_s6 + $0x70] sm:$0xff] }
0x1239   :  { %v1667_v45 = vmul.f32 %v2438_v52, %v1659_v32  ;;  %1872 = vmatpush.msra.mxu0 %v2198_v30  ;;  %v2197_v52 = vld [vmem:[%s3150_s6 + $0x68] sm:$0xff]  ;;  %v2196_v32 = vld [vmem:[%s3150_s6 + $0x60] sm:$0xff] }
0x123b   :  { %2186 = vmatmul.msk.f32.vlgmr.msrb.gmra.mxu1 %vm149_vm8, %v1667_v45  ;;  %1873 = vmatpush.msra.mxu0 %v2197_v52  ;;  %v2195_v45 = vld [vmem:[%s3150_s6 + $0x58] sm:$0xff] }
0x123d   :  { %1874 = vmatpush.msra.mxu0 %v2196_v32 }
0x123e   :  { %v2440_v33 = vpop.eup %2439 }
0x123f   :  { %1875 = vmatpush.msra.mxu0 %v2195_v45 }
0x1240   :  { %v1662_v54 = vpop.f32.mrf.mxu0 }
0x1241   :  { %v1668_v34 = vmul.f32 %v2440_v33, %v1662_v54  ;;  %v2194_v33 = vld [vmem:[%s3150_s6 + $0x50] sm:$0xff]  ;;  %v2193_v54 = vld [vmem:[%s3150_s6 + $0x48] sm:$0xff] }
0x1242   :  { %1876 = vmatpush.msra.mxu0 %v2194_v33 }
0x1243   :  { %2187 = vmatmul.msk.f32.gmra.mxu1 %vm149_vm8, %v1668_v34  ;;  %v2192_v34 = vld [vmem:[%s3150_s6 + $0x40] sm:$0xff] }
0x1244   :  { %1877 = vmatpush.msra.mxu0 %v2193_v54 }
0x1246   :  { %1878 = vmatpush.msra.mxu0 %v2192_v34  ;;  %v2348_v34 = vld [vmem:[%s3151_s7 + $0xd] ss:$0 sm:$0xff] }
0x1250   :  { %v1733_v35 = vpop.f32.mrf.mxu3 }
0x1258   :  { %v1736_v37 = vpop.f32.mrf.mxu3 }
0x12b8   :  { %v1698_v36 = vpop.f32.mrf.mxu1 }
0x12b9   :  { %v1734_v18 = vadd.f32 %v1733_v35, %v1698_v36  ;;  %v2346_v35 = vld [vmem:[%s3149_s5 + $0xe8] ss:$0 sm:$0xff] }
0x12bb   :  { %v1742_v20 = vadd.f32 %v1740_v17, %v1734_v18 }
0x12bd   :  { %v1744_v16 = vadd.f32 %v1742_v20, %v2985_v1 }
0x12bf   :  { %v1748_v19 = vsel %vm40_vm0, %v1744_v16, 0.0 }
0x12c0   :  { %1749 = vadd.xlane.f32.xlu1 %v1748_v19  ;;  %v1701_v39 = vpop.f32.mrf.mxu1 }
0x12c1   :  { %v1737_v21 = vadd.f32 %v1736_v37, %v1701_v39 }
0x12c3   :  { %v1743_v23 = vadd.f32 %v1740_v17, %v1737_v21 }
0x12c5   :  { %v1745_v25 = vadd.f32 %v1743_v23, %v2993_v5  ;;  %v2148_v5 = vld [vmem:[%s3149_s5 + $0xd0] sm:$0xff] }
0x12c6   :  { %1817 = vmatpush.msra.mxu2 %v2148_v5  ;;  %v2347_v5 = vld [vmem:[%s3151_s7 + $0xf] ss:$0 sm:$0xff] }
0x12c7   :  { %v1751_v40 = vsel %vm40_vm0, %v1745_v25, 0.0 }
0x12c8   :  { %1752 = vadd.xlane.f32.xlu0 %v1751_v40  ;;  %1818 = vmatpush.msra.mxu2 %v2145_v55 }
0x12ca   :  { %1819 = vmatpush.msra.mxu2 %v2142_v56 }
0x12cc   :  { %1820 = vmatpush.msra.mxu2 %v2139_v57 }
0x1333   :  { %v1750_v41 = vpop.xlane.xlu1 %1749 }
0x1334   :  { %v1754_v42 = vmul.f32 %v1750_v41, %v2561_v10 }
0x1336   :  { %v1756_v43 = vsub.f32 %v1744_v16, %v1754_v42 }
0x1338   :  { %v1758_v44 = vmul.f32 %v1756_v43, %v1756_v43 }
0x133a   :  { %v1760_v47 = vsel %vm40_vm0, %v1758_v44, 0.0 }
0x133b   :  { %1761 = vadd.xlane.f32.xlu2 %v1760_v47  ;;  %v1753_v1 = vpop.xlane.xlu0 %1752 }
0x133c   :  { %v1755_v48 = vmul.f32 %v1753_v1, %v2561_v10 }
0x133e   :  { %v1757_v50 = vsub.f32 %v1745_v25, %v1755_v48 }
0x1340   :  { %v1759_v51 = vmul.f32 %v1757_v50, %v1757_v50 }
0x1342   :  { %v1763_v53 = vsel %vm40_vm0, %v1759_v51, 0.0 }
0x1343   :  { %1764 = vadd.xlane.f32.xlu1 %v1763_v53 }
0x13ae   :  { %v1762_v58 = vpop.xlane.xlu2 %1761 }
0x13af   :  { %v1766_v4 = vmul.f32 %v1762_v58, %v2561_v10 }
0x13b1   :  { %v1768_v59 = vadd.f32 1e-05, %v1766_v4 }
0x13b3   :  { %2441 = vrsqrt.f32 %v1768_v59  ;;  %vm1776_vm7 = vweird.f32 %v1768_v59 }
0x13b6   :  { %v1765_v60 = vpop.xlane.xlu1 %1764 }
0x13b7   :  { %v1767_v61 = vmul.f32 %v1765_v60, %v2561_v10 }
0x13b9   :  { %v2442_v62 = vpop.eup %2441  ;;  %v1769_v13 = vadd.f32 1e-05, %v1767_v61 }
0x13ba   :  { %v1771_v63 = vmul.f32 %v2442_v62, %v1768_v59  ;;  %vm1777_vm5 = vweird.f32 %v2442_v62 }
0x13bb   :  { %2443 = vrsqrt.f32 %v1769_v13  ;;  %vm1778_vm9 = vmor %vm1776_vm7, %vm1777_vm5  ;;  %vm1786_vm11 = vweird.f32 %v1769_v13  ;;  %vm2031_vm7 = vcmask 7168  }
0x13bc   :  { %v1772_v0 = vmul.f32 %v2442_v62, %v1771_v63 }
0x13be   :  { %v1773_v22 = vmul.f32 0.5, %v1772_v0 }
0x13c0   :  { %v1774_v24 = vsub.f32 1.5, %v1773_v22 }
0x13c1   :  { %v2444_v26 = vpop.eup %2443 }
0x13c2   :  { %v1775_v29 = vmul.f32 %v2442_v62, %v1774_v24  ;;  %v1781_v2 = vmul.f32 %v2444_v26, %v1769_v13  ;;  %vm1787_vm10 = vweird.f32 %v2444_v26 }
0x13c3   :  { %vm1788_vm12 = vmor %vm1786_vm11, %vm1787_vm10 }
0x13c4   :  { %v1779_v38 = vsel %vm1778_vm9, %v2442_v62, %v1775_v29  ;;  %v1782_v3 = vmul.f32 %v2444_v26, %v1781_v2 }
0x13c5   :  { %v1790_v6 = vmul.f32 %v1779_v38, %v1756_v43  ;;  %v1943_v38 = vld [vmem:[%s3148_s4 + $0x18] sm:$0xff] }
0x13c6   :  { %v1783_v11 = vmul.f32 0.5, %v1782_v3  ;;  %1964 = vmatpush.msra.mxu1 %v1943_v38  ;;  %v1942_v3 = vld [vmem:[%s3148_s4 + $0x10] sm:$0xff] }
0x13c7   :  { %v1793_v12 = vmul.f32 %v2344_v49, %v1790_v6  ;;  %v1941_v6 = vld [vmem:[%s3148_s4 + $0x8] sm:$0xff] }
0x13c8   :  { %v1784_v9 = vsub.f32 1.5, %v1783_v11  ;;  %1965 = vmatpush.msra.mxu1 %v1942_v3 }
0x13c9   :  { %v1796_v31 = vadd.f32 %v2345_v7, %v1793_v12 }
0x13ca   :  { %v1785_v14 = vmul.f32 %v2444_v26, %v1784_v9  ;;  %1966 = vmatpush.msra.mxu1 %v1941_v6 }
0x13cb   :  { %2190 = vmatmul.msk.f32.vlgmr.msra.gmra.mxu2 %vm40_vm0, %v1796_v31 }
0x13cc   :  { %v1789_v15 = vsel %vm1788_vm12, %v2444_v26, %v1785_v14  ;;  %v2502_v14 = vmov 0   ;;  %vm2077_vm12 = vcmask 0  }
0x13cd   :  { %v1791_v8 = vmul.f32 %v1789_v15, %v1757_v50  ;;  %2320 = vset.pattern.permute.xlu1 %v2502_v14  ;;  %2321 = vset.pattern.permute.xlu2 %v2502_v14 }
0x13ce   :  { %2327 = vset.pattern.permute.xlu0 %v2502_v14 }
0x13cf   :  { %v1794_v27 = vmul.f32 %v2344_v49, %v1791_v8 }
0x13d1   :  { %v1797_v28 = vadd.f32 %v2345_v7, %v1794_v27  ;;  %v1940_v7 = vld [vmem:[%s3148_s4] sm:$0xff] }
0x13d2   :  { %1967 = vmatpush.msra.mxu1 %v1940_v7 }
0x13d3   :  { %2191 = vmatmul.msk.f32.gmra.mxu2 %vm40_vm0, %v1797_v28 }
0x144e   :  { %v1822_v36 = vpop.f32.mrf.mxu2 }
0x144f   :  { %v1823_v17 = vadd.f32 %v2346_v35, %v1822_v36 }
0x1451   :  { %v1828_v18 = vmul.f32 %v1823_v17, %v1823_v17 }
0x1453   :  { %v1830_v20 = vmul.f32 %v1828_v18, %v1823_v17 }
0x1455   :  { %v1832_v16 = vmul.f32 0.044715, %v1830_v20 }
0x1456   :  { %v1825_v19 = vpop.f32.mrf.mxu2 }
0x1457   :  { %v1834_v37 = vadd.f32 %v1832_v16, %v1823_v17  ;;  %v1826_v39 = vadd.f32 %v2346_v35, %v1825_v19 }
0x1459   :  { %v1836_v21 = vmul.f32 0.7978846, %v1834_v37  ;;  %v1829_v23 = vmul.f32 %v1826_v39, %v1826_v39 }
0x145b   :  { %2445 = vtanh.f32 %v1836_v21  ;;  %v1831_v25 = vmul.f32 %v1829_v23, %v1826_v39 }
0x145d   :  { %v1833_v40 = vmul.f32 0.044715, %v1831_v25 }
0x145f   :  { %v1835_v41 = vadd.f32 %v1833_v40, %v1826_v39  ;;  %v2350_v40 = vld [vmem:[%s3148_s4 + $0x20] ss:$0 sm:$0xff]  ;;  %s2507_s4 = smov [#allocation2]  }
0x1460   :  { %s2084_s26 = sshll.u32 %s2507_s4, 4  ;;  %s2085_s26 = int_to_ptr.vmem [resolvable:$true] %s2084_s26 }
0x1461   :  { %v2446_v42 = vpop.eup %2445  ;;  %v1837_v43 = vmul.f32 0.7978846, %v1835_v41 }
0x1462   :  { %v1840_v44 = vadd.f32 1.0, %v2446_v42 }
0x1463   :  { %2447 = vtanh.f32 %v1837_v43 }
0x1464   :  { %v1842_v47 = vmul.f32 0.5, %v1840_v44 }
0x1466   :  { %v1844_v1 = vmul.f32 %v1842_v47, %v1823_v17  ;;  %v2349_v17 = vld [vmem:[%s3151_s7 + $0xe] ss:$0 sm:$0xff]  ;;  %v1975_v47 = vld [vmem:[%s3147_s3] sm:$0xff] }
0x1467   :  { %vm2013_vm4 = vcmp.ne.s32.totalorder %v1975_v47, 4294967196 }
0x1468   :  { %2200 = vmatmul.msk.f32.vlgmr.msra.gmra.mxu0 %vm938_vm6, %v1844_v1  ;;  %v2503_v1 = vmov 0.0  }
0x1469   :  { %v2448_v48 = vpop.eup %2447 }
0x146a   :  { %v1841_v50 = vadd.f32 1.0, %v2448_v48 }
0x146c   :  { %v1843_v51 = vmul.f32 0.5, %v1841_v50  ;;  %v2204_v50 = vsel %vm2013_vm4, 1.0, %v2503_v1 }
0x146e   :  { %v1845_v53 = vmul.f32 %v1843_v51, %v1826_v39 }
0x1470   :  { %2201 = vmatmul.msk.f32.gmra.mxu0 %vm938_vm6, %v1845_v53 }
0x14e5   :  { %v1880_v55 = vpop.f32.mrf.mxu0 }
0x14e6   :  { %v1881_v56 = vadd.f32 %v2347_v5, %v1880_v55 }
0x14e8   :  { %v1886_v57 = vadd.f32 %v1881_v56, %v1796_v31  ;;  %v1976_v31 = vld [vmem:[%s3147_s3 + $0x8] sm:$0xff]  ;;  %v1997_v56 = vlaneseq  ;;  %s2506_s3 = smov 127  }
0x14e9   :  { %vm2014_vm3 = vcmp.ne.s32.totalorder %v1976_v31, 4294967196 }
0x14ea   :  { %v1890_v58 = vsel %vm40_vm0, %v1886_v57, 0.0  ;;  %v2205_v48 = vsel %vm2014_vm3, 1.0, %v2503_v1 }
0x14eb   :  { %1891 = vadd.xlane.f32.xlu1 %v1890_v58  ;;  %v2322_v51 = vpack.i.bf16 %v2204_v50, %v2205_v48 }
0x14ed   :  { %v1883_v4 = vpop.f32.mrf.mxu0 }
0x14ee   :  { %v1884_v59 = vadd.f32 %v2347_v5, %v1883_v4  ;;  %v1998_v4 = vand.u32 127, %v1997_v56 }
0x14f0   :  { %v1887_v60 = vadd.f32 %v1884_v59, %v1797_v28 }
0x14f2   :  { %v1893_v61 = vsel %vm40_vm0, %v1887_v60, 0.0 }
0x14f3   :  { %1894 = vadd.xlane.f32.xlu1 %v1893_v61 }
0x155e   :  { %v1892_v62 = vpop.xlane.xlu1 %1891 }
0x155f   :  { %v1896_v13 = vmul.f32 %v1892_v62, %v2561_v10 }
0x1561   :  { %v1898_v63 = vsub.f32 %v1886_v57, %v1896_v13 }
0x1563   :  { %v1900_v0 = vmul.f32 %v1898_v63, %v1898_v63 }
0x1565   :  { %v1902_v22 = vsel %vm40_vm0, %v1900_v0, 0.0 }
0x1566   :  { %1903 = vadd.xlane.f32.xlu1 %v1902_v22  ;;  %v1895_v24 = vpop.xlane.xlu1 %1894 }
0x1567   :  { %v1897_v26 = vmul.f32 %v1895_v24, %v2561_v10 }
0x1569   :  { %v1899_v29 = vsub.f32 %v1887_v60, %v1897_v26 }
0x156b   :  { %v1901_v2 = vmul.f32 %v1899_v29, %v1899_v29 }
0x156d   :  { %v1905_v49 = vsel %vm40_vm0, %v1901_v2, 0.0 }
0x156e   :  { %1906 = vadd.xlane.f32.xlu1 %v1905_v49 }
0x1587   :  { %2003 = vperm.xlu1 %2320, %v1976_v31  }
0x15d9   :  { %v1904_v11 = vpop.xlane.xlu1 %1903 }
0x15da   :  { %v1908_v12 = vmul.f32 %v1904_v11, %v2561_v10 }
0x15dc   :  { %v1910_v9 = vadd.f32 1e-05, %v1908_v12 }
0x15de   :  { %2449 = vrsqrt.f32 %v1910_v9  ;;  %vm1918_vm13 = vweird.f32 %v1910_v9 }
0x15e1   :  { %v1907_v15 = vpop.xlane.xlu1 %1906 }
0x15e2   :  { %v1909_v8 = vmul.f32 %v1907_v15, %v2561_v10 }
0x15e4   :  { %v2450_v27 = vpop.eup %2449  ;;  %v1911_v28 = vadd.f32 1e-05, %v1909_v8 }
0x15e5   :  { %v1913_v46 = vmul.f32 %v2450_v27, %v1910_v9  ;;  %vm1919_vm6 = vweird.f32 %v2450_v27 }
0x15e6   :  { %2451 = vrsqrt.f32 %v1911_v28  ;;  %vm1920_vm14 = vmor %vm1918_vm13, %vm1919_vm6  ;;  %vm1928_vm1 = vweird.f32 %v1911_v28 }
0x15e7   :  { %v1914_v30 = vmul.f32 %v2450_v27, %v1913_v46  ;;  %v2505_v46 = vmov 1.0  }
0x15e9   :  { %v1915_v52 = vmul.f32 0.5, %v1914_v30 }
0x15eb   :  { %v1916_v32 = vsub.f32 1.5, %v1915_v52 }
0x15ec   :  { %v2452_v45 = vpop.eup %2451 }
0x15ed   :  { %v1917_v33 = vmul.f32 %v2450_v27, %v1916_v32  ;;  %v1923_v54 = vmul.f32 %v2452_v45, %v1911_v28  ;;  %vm1929_vm15 = vweird.f32 %v2452_v45 }
0x15ee   :  { %vm1930_vm2 = vmor %vm1928_vm1, %vm1929_vm15 }
0x15ef   :  { %v1921_v35 = vsel %vm1920_vm14, %v2450_v27, %v1917_v33  ;;  %v1924_v36 = vmul.f32 %v2452_v45, %v1923_v54 }
0x15f0   :  { %v1932_v10 = vmul.f32 %v1921_v35, %v1898_v63 }
0x15f1   :  { %v1925_v18 = vmul.f32 0.5, %v1924_v36 }
0x15f2   :  { %v1935_v20 = vmul.f32 %v2348_v34, %v1932_v10 }
0x15f3   :  { %v1926_v16 = vsub.f32 1.5, %v1925_v18 }
0x15f4   :  { %v1938_v19 = vadd.f32 %v2349_v17, %v1935_v20 }
0x15f5   :  { %v1927_v37 = vmul.f32 %v2452_v45, %v1926_v16 }
0x15f6   :  { %2202 = vmatmul.msk.f32.vlgmr.msra.gmra.mxu1 %vm40_vm0, %v1938_v19 }
0x15f7   :  { %v1931_v39 = vsel %vm1930_vm2, %v2452_v45, %v1927_v37 }
0x15f8   :  { %v1933_v21 = vmul.f32 %v1931_v39, %v1899_v29 }
0x15f9   :  { %v2004_v63 = vpop.permute.xlu1 %2003 }
0x15fa   :  { %v1936_v23 = vmul.f32 %v2348_v34, %v1933_v21  ;;  %vm2006_vm5 = vcmp.eq.s32.totalorder %v1998_v4, %v2004_v63 }
0x15fc   :  { %v1939_v25 = vadd.f32 %v2349_v17, %v1936_v23 }
0x15fe   :  { %2203 = vmatmul.msk.f32.gmra.mxu1 %vm40_vm0, %v1939_v25 }
0x1673   :  { %v1969_v41 = vpop.f32.mrf.mxu1 }
0x1674   :  { %v1970_v42 = vadd.f32 %v2350_v40, %v1969_v41 }
0x1676   :  { %1977 = vmax.xlane.f32.xlu0 %v1970_v42 }
0x167b   :  { %v1972_v43 = vpop.f32.mrf.mxu1 }
0x167c   :  { %v1973_v44 = vadd.f32 %v2350_v40, %v1972_v43 }
0x167e   :  { %1979 = vmax.xlane.f32.xlu2 %v1973_v44  ;;  %v2008_v0 = vsel %vm2006_vm5, %v1973_v44, 0.0 }
0x1696   :  { %2000 = vperm.xlu2 %2321, %v1975_v47  }
0x169e   :  { %2323 = vrot.lane.b32.xlu2 %v2322_v51, %s2504_s24 }
0x16e9   :  { %v1978_v55 = vpop.xlane.xlu0 %1977 }
0x16ea   :  { %v1981_v58 = vsub.f32 %v1970_v42, %v1978_v55 }
0x16ec   :  { %v1983_v60 = vmul.f32 1.442695, %v1981_v58 }
0x16f1   :  { %v1980_v53 = vpop.xlane.xlu2 %1979 }
0x16f2   :  { %v1982_v5 = vsub.f32 %v1973_v44, %v1980_v53 }
0x16f4   :  { %v1985_v57 = vmul.f32 1.442695, %v1982_v5 }
0x16f6   :  { %2453 = vpow2.f32 %v1985_v57 }
0x16f7   :  { %2455 = vpow2.f32 %v1983_v60 }
0x16f9   :  { %v2001_v59 = vpop.permute.xlu2 %2000 }
0x16fa   :  { %vm2005_vm0 = vcmp.eq.s32.totalorder %v1998_v4, %v2001_v59 }
0x16fb   :  { %v2007_v61 = vsel %vm2005_vm0, %v1970_v42, 0.0 }
0x16fc   :  { %v2454_v62 = vpop.eup %2453  ;;  %2009 = vadd.xlane.f32.xlu1 %v2007_v61 }
0x16fd   :  { %1989 = vadd.xlane.f32.xlu0 %v2454_v62  ;;  %v2456_v13 = vpop.eup %2455 }
0x1701   :  { %v2324_v2 = vpop.permute.xlu2 %2323 }
0x1702   :  { %v2325_v11 = vunpack.i.l.bf16 %v2324_v2  ;;  %v2326_v8 = vunpack.i.h.bf16 %v2324_v2 }
0x1705   :  { %1987 = vadd.xlane.f32.xlu0 %v2456_v13 }
0x170d   :  { %2011 = vadd.xlane.f32.xlu0 %v2008_v0 }
0x176f   :  { %v2010_v9 = vpop.xlane.xlu1 %2009 }
0x1770   :  { %v1990_v22 = vpop.xlane.xlu0 %1989 }
0x1771   :  { %2457 = vlog2.f32 %v1990_v22 }
0x1777   :  { %v2458_v24 = vpop.eup %2457 }
0x1778   :  { %v1988_v26 = vpop.xlane.xlu0 %1987  ;;  %v1994_v29 = vmul.f32 0.6931472, %v2458_v24 }
0x1779   :  { %2459 = vlog2.f32 %v1988_v26 }
0x177a   :  { %v1996_v38 = vadd.f32 %v1994_v29, %v1980_v53 }
0x177f   :  { %v2460_v49 = vpop.eup %2459 }
0x1780   :  { %v1992_v3 = vmul.f32 0.6931472, %v2460_v49  ;;  %v2012_v6 = vpop.xlane.xlu0 %2011 }
0x1781   :  { %v2020_v7 = vsub.f32 %v1996_v38, %v2012_v6 }
0x1782   :  { %v1995_v12 = vadd.f32 %v1992_v3, %v1978_v55 }
0x1783   :  { %v2022_v31 = vmul.f32 %v2205_v48, %v2020_v7 }
0x1784   :  { %v2019_v14 = vsub.f32 %v1995_v12, %v2010_v9 }
0x1785   :  { %v2033_v15 = vsel %vm2031_vm7, %v2022_v31, %v2325_v11 }
0x1786   :  { %2051 = vmatpush.msra.mxu3 %v2033_v15  ;;  %v2021_v27 = vmul.f32 %v2204_v50, %v2019_v14 }
0x1788   :  { %v2032_v28 = vsel %vm2031_vm7, %v2021_v27, %v2326_v8 }
0x1789   :  { %2052 = vmatpush.msra.mxu3 %v2032_v28 }
0x178a   :  { %2206 = vmatmul.msk.f32.vlgmr.msra.gmra.mxu3 %vm149_vm8, %v2505_v46 }
0x180d   :  { %v2054_v30 = vpop.f32.mrf.mxu3 }
0x180e   :  { %v2057_v52 = vmax.f32 %v2054_v30, 1.0 }
0x1810   :  { %2059 = vrot.lane.b32.xlu0 %v2057_v52, %s2506_s3 }
0x1882   :  { %v2060_v32 = vpop.permute.xlu0 %2059 }
0x1883   :  { %2461 = vrcp.f32 %v2060_v32  ;;  %v2073_v34 = vand.u32 2147483648, %v2060_v32  ;;  %v2071_v36 = vand.u32 2147483647, %v2060_v32  ;;  %vm2067_vm10 = vweird.f32 %v2060_v32 }
0x1885   :  { %v2074_v17 = vor.u32 1.1754944e-38, %v2073_v34  ;;  %vm2072_vm8 = vcmp.eq.f32.partialorder %v2071_v36, 8.507059e+37 }
0x1889   :  { %v2462_v45 = vpop.eup %2461 }
0x188a   :  { %v2063_v33 = vmul.f32 %v2462_v45, %v2060_v32  ;;  %vm2068_vm9 = vweird.f32 %v2462_v45 }
0x188b   :  { %vm2069_vm11 = vmor %vm2067_vm10, %vm2068_vm9 }
0x188c   :  { %v2064_v54 = vsub.f32 1.0, %v2063_v33 }
0x188e   :  { %v2065_v35 = vmul.f32 %v2462_v45, %v2064_v54 }
0x1890   :  { %v2066_v10 = vadd.f32 %v2462_v45, %v2065_v35 }
0x1892   :  { %v2070_v18 = vsel %vm2069_vm11, %v2462_v45, %v2066_v10 }
0x1893   :  { %v2075_v20 = vsel %vm2072_vm8, %v2074_v17, %v2070_v18 }
0x1894   :  { %v2076_v16 = vmul.f32 %v2075_v20, %v2054_v30 }
0x1896   :  { %2078 = vst.msk [vmem:[#allocation2] sm:$0x1] %vm2077_vm12, %v2076_v16 }
0x1897   :  { %2089 = dma.vmem_to_hbm [thread:$0]  %s2085_s26, 16, %s2087_s23, [#allocation3]  }
0x1898   :  { %2493 = dma.done.wait [#allocation3], 16  }
0x1899   :  { %2494 = vsyncadd [#allocation3], 4294967280 }
0x189a   :  { %2094 = vsyncpa [#allocation3], 1 }

</bundles_post_ra>
